<compile_context>
chip_gen: v6e
topology: v6e:2x2x1
jax: 0.10.0
libtpu: 0.0.40
codegen_flags: <defaults>
</compile_context>

<pallas_src>
import functools

import jax
import jax.numpy as jnp
import numpy as np
from jax import lax
from jax.experimental import pallas as pl
from jax.experimental.pallas import tpu as pltpu


def _round_up(x, m):
    return ((x + m - 1) // m) * m


def _vmem_bytes(chunk, bshard, ninput_p, nhid_p):
    """Rough VMEM working-set estimate (assumes double-buffered pipelined operands)."""
    nhid4_p = 4 * nhid_p
    est = 0
    est += 2 * chunk * bshard * ninput_p * 2      # x chunk (bf16, 2 bufs)
    est += 2 * chunk * bshard * nhid_p * 4        # out chunk (f32, 2 bufs)
    est += 2 * ninput_p * nhid4_p * 2             # W (bf16)
    est += 2 * nhid_p * nhid4_p * 2               # U (bf16)
    est += 2 * nhid4_p * 4                        # b
    est += 4 * bshard * nhid_p * 4                # h0, c0
    est += 2 * bshard * nhid_p * 4                # c_out
    est += chunk * bshard * nhid4_p * 4           # gx scratch (f32)
    est += 2 * bshard * nhid_p * 4                # h / c carry scratch
    return est


def _choose_chunk(seq, bshard, ninput_p, nhid_p, budget=24 << 20):
    """Largest time chunk (<= 64) whose working set fits the VMEM budget."""
    per_t = bshard * (2 * ninput_p * 2 + 2 * nhid_p * 4 + 4 * nhid_p * 4)
    fixed = _vmem_bytes(0, bshard, ninput_p, nhid_p)
    avail = max(budget - fixed, per_t)
    return int(max(1, min(seq, 64, avail // per_t)))


def _lstm_kernel(x_ref, w_ref, u_ref, b_ref, h0_ref, c0_ref,
                 out_ref, c_out_ref,
                 gx_sc, h_sc, c_sc,
                 *, seq, chunk):
    """One (batch_shard, time_chunk) grid step of the recurrence."""
    t_chunk = pl.program_id(1)

    # Re-initialize the carry at the first time chunk of every batch shard.
    @pl.when(t_chunk == 0)
    def _():
        h_sc[...] = h0_ref[...]
        c_sc[...] = c0_ref[...]

    ch, bsh, nin = x_ref.shape
    nhid = h_sc.shape[1]                              # padded hidden (mult of 128)

    # (1) Input projection for all timesteps of this chunk: one big MXU matmul
    #     (bf16 inputs, f32 accumulation), bias folded in once.
    x2d = x_ref[...].reshape(ch * bsh, nin)
    gx = jnp.dot(x2d, w_ref[...], preferred_element_type=jnp.float32) + b_ref[...]
    gx_sc[...] = gx.reshape(ch, bsh, 4 * nhid)

    u = u_ref[...]                                    # bf16 recurrent weights (VMEM-resident)

    def sigm(v):                                      # 1 EUP push instead of 2
        return 0.5 * (jnp.tanh(0.5 * v) + 1.0)

    def step(t, carry):
        h_prev = h_sc[...]
        c_prev = c_sc[...]
        # (2) Only the small recurrent matmul stays on the serial path.
        gates = gx_sc[t] + jnp.dot(h_prev.astype(u.dtype), u,
                                   preferred_element_type=jnp.float32)
        # Gate slices are static and 128-lane aligned -> free views.
        i = sigm(gates[:, 0 * nhid:1 * nhid])
        f = sigm(gates[:, 1 * nhid:2 * nhid])
        g = jnp.tanh(gates[:, 2 * nhid:3 * nhid])
        o = sigm(gates[:, 3 * nhid:4 * nhid])
        c_t = f * c_prev + i * g
        h_t = o * jnp.tanh(c_t)
        h_sc[...] = h_t
        c_sc[...] = c_t
        out_ref[t] = h_t.astype(out_ref.dtype)

        # Capture the cell state at the true final timestep (seq may be ragged
        # w.r.t. the chunk; trailing padded timesteps are discarded).
        @pl.when(t_chunk * chunk + t == seq - 1)
        def _():
            c_out_ref[...] = c_t.astype(c_out_ref.dtype)

        return carry

    # Partial unroll: full for short chunks, 4 otherwise (bounds vreg pressure).
    lax.fori_loop(0, ch, step, 0, unroll=(ch if ch <= 8 else 4))


def my_lstm_forward(x, W, U, b, state=None, chunk=None):
    """x: (seq, batch, ninput) f32; W:(ninput,4*nhid); U:(nhid,4*nhid); b:(4*nhid,).
    Returns (output, (h_t, c_t)) matching MyLSTM.forward (dropout = identity)."""
    seq, batch, ninput = x.shape
    nhid = W.shape[1] // 4

    # (8,128)-aligned padded sizes.
    batch_p = _round_up(batch, 8)
    nhid_p = _round_up(nhid, 128)
    ninput_p = _round_up(ninput, 128)
    nhid4_p = 4 * nhid_p

    # Batch sharding: two shards (>= 16 rows each) so v7x's second TensorCore
    # runs an independent slice of the (batch-parallel) recurrence.
    if batch_p >= 32:
        bshard = _round_up(batch_p // 2, 8)
        n_bsh = 2
        batch_p = 2 * bshard
    else:
        bshard = batch_p
        n_bsh = 1

    if chunk is None:
        chunk = _choose_chunk(seq, bshard, ninput_p, nhid_p)
    chunk = int(min(chunk, seq))
    n_tc = pl.cdiv(seq, chunk)
    seq_p = n_tc * chunk

    # Gate-aware zero padding: each of the [i|f|g|o] blocks is padded to nhid_p
    # so gate boundaries stay lane-tile aligned.
    Wp = jnp.zeros((ninput_p, 4, nhid_p), jnp.float32)
    Wp = Wp.at[:ninput, :, :nhid].set(W.reshape(ninput, 4, nhid))
    Up = jnp.zeros((nhid_p, 4, nhid_p), jnp.float32)
    Up = Up.at[:nhid, :, :nhid].set(U.reshape(nhid, 4, nhid))
    bp = jnp.zeros((4, nhid_p), jnp.float32).at[:, :nhid].set(b.reshape(4, nhid))

    Wp = Wp.reshape(ninput_p, nhid4_p).astype(jnp.bfloat16)     # bf16 MXU weights
    Up = Up.reshape(nhid_p, nhid4_p).astype(jnp.bfloat16)
    bp = bp.reshape(1, nhid4_p)                                 # f32, post-accum add

    # Padded activations; cast fused into the same (single) padding pass.
    xp = jnp.zeros((seq_p, batch_p, ninput_p), jnp.bfloat16)
    xp = xp.at[:seq, :batch, :ninput].set(x.astype(jnp.bfloat16))

    if state is None:
        h0 = jnp.zeros((batch, nhid), jnp.float32)
        c0 = jnp.zeros((batch, nhid), jnp.float32)
    else:
        h0, c0 = state
    h0p = jnp.zeros((batch_p, nhid_p), jnp.float32).at[:batch, :nhid].set(h0)
    c0p = jnp.zeros((batch_p, nhid_p), jnp.float32).at[:batch, :nhid].set(c0)

    est = _vmem_bytes(chunk, bshard, ninput_p, nhid_p)
    vmem_limit = max(48 << 20, est + (4 << 20))    # fits v7x's 64 MiB at the chosen budget

    kernel = functools.partial(_lstm_kernel, seq=seq, chunk=chunk)

    out3d, c_p = pl.pallas_call(
        kernel,
        out_shape=(
            jax.ShapeDtypeStruct((seq_p, batch_p, nhid_p), jnp.float32),
            jax.ShapeDtypeStruct((batch_p, nhid_p), jnp.float32),
        ),
        grid_spec=pltpu.PrefetchScalarGridSpec(
            num_scalar_prefetch=0,
            grid=(n_bsh, n_tc),                       # (batch shards, time chunks)
            in_specs=[
                pl.BlockSpec((chunk, bshard, ninput_p), lambda bi, ti: (ti, bi, 0)),  # x
                pl.BlockSpec((ninput_p, nhid4_p), lambda bi, ti: (0, 0)),             # W (resident)
                pl.BlockSpec((nhid_p, nhid4_p), lambda bi, ti: (0, 0)),               # U (resident)
                pl.BlockSpec((1, nhid4_p), lambda bi, ti: (0, 0)),                    # b (resident)
                pl.BlockSpec((bshard, nhid_p), lambda bi, ti: (bi, 0)),               # h0
                pl.BlockSpec((bshard, nhid_p), lambda bi, ti: (bi, 0)),               # c0
            ],
            out_specs=[
                pl.BlockSpec((chunk, bshard, nhid_p), lambda bi, ti: (ti, bi, 0)),    # output
                pl.BlockSpec((bshard, nhid_p), lambda bi, ti: (bi, 0)),               # c_t
            ],
            scratch_shapes=[
                pltpu.VMEM((chunk, bshard, nhid4_p), jnp.float32),  # gates_x, this chunk
                pltpu.VMEM((bshard, nhid_p), jnp.float32),          # h carry
                pltpu.VMEM((bshard, nhid_p), jnp.float32),          # c carry
            ],
        ),
        compiler_params=pltpu.CompilerParams(
            dimension_semantics=("parallel", "arbitrary"),   # batch parallel, time serial
            vmem_limit_bytes=int(vmem_limit),
        ),
    )(xp, Wp, Up, bp, h0p, c0p)

    out = out3d[:seq, :batch, :nhid]
    h_t = out[-1]                                    # final hidden == output[-1]
    c_t = c_p[:batch, :nhid]
    return out, (h_t, c_t)


def _reference_f32(x, W, U, b, state=None):
    """Pure-f32 JAX mirror of the PyTorch forward (dropout = identity)."""
    nhid = W.shape[1] // 4
    batch = x.shape[1]
    if state is None:
        h0 = jnp.zeros((batch, nhid), jnp.float32)
        c0 = jnp.zeros((batch, nhid), jnp.float32)
    else:
        h0, c0 = state

    def step(carry, x_t):
        h, c = carry
        gates = x_t @ W + h @ U + b
        i = jax.nn.sigmoid(gates[:, :nhid])
        f = jax.nn.sigmoid(gates[:, nhid:2 * nhid])
        g = jnp.tanh(gates[:, 2 * nhid:3 * nhid])
        o = jax.nn.sigmoid(gates[:, 3 * nhid:])
        c = f * c + i * g
        h = o * jnp.tanh(c)
        return (h, c), h

    (h_t, c_t), ys = lax.scan(step, (h0, c0), x)
    return ys, (h_t, c_t)


def _reference_bf16(x, W, U, b, state=None):
    """Mirror of the kernel's numerics: bf16 MXU inputs, f32 accumulation/gates."""
    seq, batch, ninput = x.shape
    nhid = W.shape[1] // 4
    if state is None:
        h0 = jnp.zeros((batch, nhid), jnp.float32)
        c0 = jnp.zeros((batch, nhid), jnp.float32)
    else:
        h0, c0 = state
    Wb = W.astype(jnp.bfloat16)
    Ub = U.astype(jnp.bfloat16)
    gx = jnp.dot(x.astype(jnp.bfloat16).reshape(seq * batch, ninput), Wb,
                 preferred_element_type=jnp.float32) + b
    gx = gx.reshape(seq, batch, 4 * nhid)

    def step(carry, gx_t):
        h, c = carry
        gates = gx_t + jnp.dot(h.astype(jnp.bfloat16), Ub,
                               preferred_element_type=jnp.float32)
        i = jax.nn.sigmoid(gates[:, :nhid])
        f = jax.nn.sigmoid(gates[:, nhid:2 * nhid])
        g = jnp.tanh(gates[:, 2 * nhid:3 * nhid])
        o = jax.nn.sigmoid(gates[:, 3 * nhid:])
        c = f * c + i * g
        h = o * jnp.tanh(c)
        return (h, c), h

    (h_t, c_t), ys = lax.scan(step, (h0, c0), gx)
    return ys, (h_t, c_t)


def _check(out, ht, ct, ref_out, ref_ht, ref_ct, rtol, atol):
    np.testing.assert_allclose(np.asarray(out), np.asarray(ref_out), rtol=rtol, atol=atol)
    np.testing.assert_allclose(np.asarray(ht), np.asarray(ref_ht), rtol=rtol, atol=atol)
    np.testing.assert_allclose(np.asarray(ct), np.asarray(ref_ct), rtol=rtol, atol=atol)


if __name__ == "__main__":
    key = jax.random.PRNGKey(0)

    # ---- Test 1: module's nominal small shapes (ninput=4, nhid=6), seq=8, batch=2
    seq, batch, ninput, nhid = 8, 2, 4, 6
    kx, kw, ku, kb, kh, kc, kx2 = jax.random.split(key, 7)
    x = jax.random.normal(kx, (seq, batch, ninput), dtype=jnp.float32)
    W = 0.3 * jax.random.normal(kw, (ninput, 4 * nhid), dtype=jnp.float32)
    U = 0.3 * jax.random.normal(ku, (nhid, 4 * nhid), dtype=jnp.float32)
    b = 0.1 * jax.random.normal(kb, (4 * nhid,), dtype=jnp.float32)

    out, (h_t, c_t) = my_lstm_forward(x, W, U, b)
    out = jax.block_until_ready(out)

    m_out, (m_h, m_c) = _reference_bf16(x, W, U, b)
    _check(out, h_t, c_t, m_out, m_h, m_c, rtol=2e-3, atol=2e-3)
    r_out, (r_h, r_c) = _reference_f32(x, W, U, b)
    _check(out, h_t, c_t, r_out, r_h, r_c, rtol=5e-2, atol=5e-2)

    # ---- Test 2: exercise time chunking (ragged seq), carry across grid steps,
    #              batch sharding ("parallel" axis) and a non-zero initial state.
    seq2, batch2 = 10, 30
    x2 = jax.random.normal(kx2, (seq2, batch2, ninput), dtype=jnp.float32)
    h0 = 0.2 * jax.random.normal(kh, (batch2, nhid), dtype=jnp.float32)
    c0 = 0.2 * jax.random.normal(kc, (batch2, nhid), dtype=jnp.float32)

    out2, (h2, c2) = my_lstm_forward(x2, W, U, b, state=(h0, c0), chunk=4)
    out2 = jax.block_until_ready(out2)

    m_out2, (m_h2, m_c2) = _reference_bf16(x2, W, U, b, state=(h0, c0))
    _check(out2, h2, c2, m_out2, m_h2, m_c2, rtol=2e-3, atol=2e-3)
    r_out2, (r_h2, r_c2) = _reference_f32(x2, W, U, b, state=(h0, c0))
    _check(out2, h2, c2, r_out2, r_h2, r_c2, rtol=5e-2, atol=5e-2)

    print("KERNEL_OK")
</pallas_src>

<mosaic_0001>
module attributes {stable_mosaic.version = 11 : i64} {
  func.func @_lstm_kernel(%arg0: i32, %arg1: i32, %arg2: memref<8x8x128xbf16, #tpu.memory_space<vmem>>, %arg3: memref<128x512xbf16, #tpu.memory_space<vmem>>, %arg4: memref<128x512xbf16, #tpu.memory_space<vmem>>, %arg5: memref<1x512xf32, #tpu.memory_space<vmem>>, %arg6: memref<8x128xf32, #tpu.memory_space<vmem>>, %arg7: memref<8x128xf32, #tpu.memory_space<vmem>>, %arg8: memref<8x8x128xf32, #tpu.memory_space<vmem>>, %arg9: memref<8x128xf32, #tpu.memory_space<vmem>>, %arg10: memref<8x8x512xf32, #tpu.memory_space<vmem>>, %arg11: memref<8x128xf32, #tpu.memory_space<vmem>>, %arg12: memref<8x128xf32, #tpu.memory_space<vmem>>) attributes {dimension_semantics = [#tpu.dimension_semantics<parallel>, #tpu.dimension_semantics<arbitrary>], iteration_bounds = array<i64: 1, 1>, scalar_prefetch = 0 : i64, scratch_operands = 3 : i64, tpu.core_type = #tpu.core_type<tc>, window_params = [{transform_indices = @transform_0, window_bounds = array<i64: 8, 8, 128>}, {pipeline_mode = #tpu.pipeline_mode<synchronous>, transform_indices = @transform_1, window_bounds = array<i64: 128, 512>}, {pipeline_mode = #tpu.pipeline_mode<synchronous>, transform_indices = @transform_2, window_bounds = array<i64: 128, 512>}, {pipeline_mode = #tpu.pipeline_mode<synchronous>, transform_indices = @transform_3, window_bounds = array<i64: 1, 512>}, {transform_indices = @transform_4, window_bounds = array<i64: 8, 128>}, {transform_indices = @transform_5, window_bounds = array<i64: 8, 128>}, {transform_indices = @transform_6, window_bounds = array<i64: 8, 8, 128>}, {transform_indices = @transform_7, window_bounds = array<i64: 8, 128>}]} {
    %c0_i32 = arith.constant 0 : i32
    %0 = arith.cmpi eq, %arg1, %c0_i32 : i32
    %1 = arith.extui %0 : i1 to i32
    %c0_i32_0 = arith.constant 0 : i32
    %2 = arith.cmpi ne, %1, %c0_i32_0 : i32
    scf.if %2 {
      %c0_213 = arith.constant 0 : index
      %c0_214 = arith.constant 0 : index
      %413 = vector.load %arg6[%c0_213, %c0_214] : memref<8x128xf32, #tpu.memory_space<vmem>>, vector<8x128xf32>
      %c0_215 = arith.constant 0 : index
      %c0_216 = arith.constant 0 : index
      %414 = vector.load %arg11[%c0_215, %c0_216] : memref<8x128xf32, #tpu.memory_space<vmem>>, vector<8x128xf32>
      tpu.vector_store %arg11[%c0_215, %c0_216], %413 {strides = array<i32>} : memref<8x128xf32, #tpu.memory_space<vmem>>, vector<8x128xf32>,
      %c0_217 = arith.constant 0 : index
      %c0_218 = arith.constant 0 : index
      %415 = vector.load %arg7[%c0_217, %c0_218] : memref<8x128xf32, #tpu.memory_space<vmem>>, vector<8x128xf32>
      %c0_219 = arith.constant 0 : index
      %c0_220 = arith.constant 0 : index
      %416 = vector.load %arg12[%c0_219, %c0_220] : memref<8x128xf32, #tpu.memory_space<vmem>>, vector<8x128xf32>
      tpu.vector_store %arg12[%c0_219, %c0_220], %415 {strides = array<i32>} : memref<8x128xf32, #tpu.memory_space<vmem>>, vector<8x128xf32>,
    } else {
    }
    %c0 = arith.constant 0 : index
    %c0_1 = arith.constant 0 : index
    %c0_2 = arith.constant 0 : index
    %3 = vector.load %arg2[%c0, %c0_1, %c0_2] : memref<8x8x128xbf16, #tpu.memory_space<vmem>>, vector<8x8x128xbf16>
    %4 = vector.shape_cast %3 : vector<8x8x128xbf16> to vector<64x128xbf16>
    %c0_3 = arith.constant 0 : index
    %c0_4 = arith.constant 0 : index
    %5 = vector.load %arg3[%c0_3, %c0_4] : memref<128x512xbf16, #tpu.memory_space<vmem>>, vector<128x512xbf16>
    %cst = arith.constant dense<0.000000e+00> : vector<64x512xf32>
    %6 = tpu.matmul %4, %5, %cst {dimension_numbers = #tpu.dot_dimension_numbers<[1], [0], [0], [1], [0, 0, 1, 1], [], []>} : vector<64x128xbf16>, vector<128x512xbf16>, vector<64x512xf32> -> vector<64x512xf32>
    %c0_5 = arith.constant 0 : index
    %c0_6 = arith.constant 0 : index
    %7 = vector.load %arg5[%c0_5, %c0_6] : memref<1x512xf32, #tpu.memory_space<vmem>>, vector<1x512xf32>
    %8 = vector.broadcast %7 : vector<1x512xf32> to vector<64x512xf32>
    %9 = arith.addf %6, %8 : vector<64x512xf32>
    %10 = vector.shape_cast %9 : vector<64x512xf32> to vector<8x8x512xf32>
    %c0_7 = arith.constant 0 : index
    %c0_8 = arith.constant 0 : index
    %c0_9 = arith.constant 0 : index
    %11 = vector.load %arg10[%c0_7, %c0_8, %c0_9] : memref<8x8x512xf32, #tpu.memory_space<vmem>>, vector<8x8x512xf32>
    tpu.vector_store %arg10[%c0_7, %c0_8, %c0_9], %10 {strides = array<i32>} : memref<8x8x512xf32, #tpu.memory_space<vmem>>, vector<8x8x512xf32>,
    %c0_10 = arith.constant 0 : index
    %c0_11 = arith.constant 0 : index
    %12 = vector.load %arg4[%c0_10, %c0_11] : memref<128x512xbf16, #tpu.memory_space<vmem>>, vector<128x512xbf16>
    %c0_i32_12 = arith.constant 0 : i32
    %c0_13 = arith.constant 0 : index
    %c0_14 = arith.constant 0 : index
    %13 = vector.load %arg11[%c0_13, %c0_14] : memref<8x128xf32, #tpu.memory_space<vmem>>, vector<8x128xf32>
    %c0_15 = arith.constant 0 : index
    %c0_16 = arith.constant 0 : index
    %14 = vector.load %arg12[%c0_15, %c0_16] : memref<8x128xf32, #tpu.memory_space<vmem>>, vector<8x128xf32>
    %15 = arith.index_cast %c0_i32_12 : i32 to index
    %c0_17 = arith.constant 0 : index
    %c0_18 = arith.constant 0 : index
    %16 = vector.load %arg10[%15, %c0_17, %c0_18] : memref<8x8x512xf32, #tpu.memory_space<vmem>>, vector<1x8x512xf32>
    %17 = vector.shape_cast %16 : vector<1x8x512xf32> to vector<8x512xf32>
    %18 = arith.truncf %13 : vector<8x128xf32> to vector<8x128xbf16>
    %cst_19 = arith.constant dense<0.000000e+00> : vector<8x512xf32>
    %19 = tpu.matmul %18, %12, %cst_19 {dimension_numbers = #tpu.dot_dimension_numbers<[1], [0], [0], [1], [0, 0, 1, 1], [], []>} : vector<8x128xbf16>, vector<128x512xbf16>, vector<8x512xf32> -> vector<8x512xf32>
    %20 = arith.addf %17, %19 : vector<8x512xf32>
    %21 = vector.extract_strided_slice %20 {offsets = [0, 0], sizes = [8, 128], strides = [1, 1]} : vector<8x512xf32> to vector<8x128xf32>
    %cst_20 = arith.constant 5.000000e-01 : f32
    %22 = vector.broadcast %cst_20 : f32 to vector<8x128xf32>
    %23 = arith.mulf %22, %21 : vector<8x128xf32>
    %24 = math.tanh %23 : vector<8x128xf32>
    %cst_21 = arith.constant 1.000000e+00 : f32
    %25 = vector.broadcast %cst_21 : f32 to vector<8x128xf32>
    %26 = arith.addf %24, %25 : vector<8x128xf32>
    %cst_22 = arith.constant 5.000000e-01 : f32
    %27 = vector.broadcast %cst_22 : f32 to vector<8x128xf32>
    %28 = arith.mulf %27, %26 : vector<8x128xf32>
    %29 = vector.extract_strided_slice %20 {offsets = [0, 128], sizes = [8, 128], strides = [1, 1]} : vector<8x512xf32> to vector<8x128xf32>
    %cst_23 = arith.constant 5.000000e-01 : f32
    %30 = vector.broadcast %cst_23 : f32 to vector<8x128xf32>
    %31 = arith.mulf %30, %29 : vector<8x128xf32>
    %32 = math.tanh %31 : vector<8x128xf32>
    %cst_24 = arith.constant 1.000000e+00 : f32
    %33 = vector.broadcast %cst_24 : f32 to vector<8x128xf32>
    %34 = arith.addf %32, %33 : vector<8x128xf32>
    %cst_25 = arith.constant 5.000000e-01 : f32
    %35 = vector.broadcast %cst_25 : f32 to vector<8x128xf32>
    %36 = arith.mulf %35, %34 : vector<8x128xf32>
    %37 = vector.extract_strided_slice %20 {offsets = [0, 256], sizes = [8, 128], strides = [1, 1]} : vector<8x512xf32> to vector<8x128xf32>
    %38 = math.tanh %37 : vector<8x128xf32>
    %39 = vector.extract_strided_slice %20 {offsets = [0, 384], sizes = [8, 128], strides = [1, 1]} : vector<8x512xf32> to vector<8x128xf32>
    %cst_26 = arith.constant 5.000000e-01 : f32
    %40 = vector.broadcast %cst_26 : f32 to vector<8x128xf32>
    %41 = arith.mulf %40, %39 : vector<8x128xf32>
    %42 = math.tanh %41 : vector<8x128xf32>
    %cst_27 = arith.constant 1.000000e+00 : f32
    %43 = vector.broadcast %cst_27 : f32 to vector<8x128xf32>
    %44 = arith.addf %42, %43 : vector<8x128xf32>
    %cst_28 = arith.constant 5.000000e-01 : f32
    %45 = vector.broadcast %cst_28 : f32 to vector<8x128xf32>
    %46 = arith.mulf %45, %44 : vector<8x128xf32>
    %47 = arith.mulf %36, %14 : vector<8x128xf32>
    %48 = arith.mulf %28, %38 : vector<8x128xf32>
    %49 = arith.addf %47, %48 : vector<8x128xf32>
    %50 = math.tanh %49 : vector<8x128xf32>
    %51 = arith.mulf %46, %50 : vector<8x128xf32>
    %c0_29 = arith.constant 0 : index
    %c0_30 = arith.constant 0 : index
    %52 = vector.load %arg11[%c0_29, %c0_30] : memref<8x128xf32, #tpu.memory_space<vmem>>, vector<8x128xf32>
    tpu.vector_store %arg11[%c0_29, %c0_30], %51 {strides = array<i32>} : memref<8x128xf32, #tpu.memory_space<vmem>>, vector<8x128xf32>,
    %c0_31 = arith.constant 0 : index
    %c0_32 = arith.constant 0 : index
    %53 = vector.load %arg12[%c0_31, %c0_32] : memref<8x128xf32, #tpu.memory_space<vmem>>, vector<8x128xf32>
    tpu.vector_store %arg12[%c0_31, %c0_32], %49 {strides = array<i32>} : memref<8x128xf32, #tpu.memory_space<vmem>>, vector<8x128xf32>,
    %54 = arith.index_cast %c0_i32_12 : i32 to index
    %c0_33 = arith.constant 0 : index
    %c0_34 = arith.constant 0 : index
    %55 = vector.load %arg8[%54, %c0_33, %c0_34] : memref<8x8x128xf32, #tpu.memory_space<vmem>>, vector<1x8x128xf32>
    %56 = vector.shape_cast %55 : vector<1x8x128xf32> to vector<8x128xf32>
    %57 = vector.shape_cast %51 : vector<8x128xf32> to vector<1x8x128xf32>
    tpu.vector_store %arg8[%54, %c0_33, %c0_34], %57 {strides = array<i32>} : memref<8x8x128xf32, #tpu.memory_space<vmem>>, vector<1x8x128xf32>,
    %c8_i32 = arith.constant 8 : i32
    %58 = arith.muli %arg1, %c8_i32 : i32
    %59 = arith.addi %58, %c0_i32_12 : i32
    %c7_i32 = arith.constant 7 : i32
    %60 = arith.cmpi eq, %59, %c7_i32 : i32
    %61 = arith.extui %60 : i1 to i32
    %c0_i32_35 = arith.constant 0 : i32
    %62 = arith.cmpi ne, %61, %c0_i32_35 : i32
    scf.if %62 {
      %c0_213 = arith.constant 0 : index
      %c0_214 = arith.constant 0 : index
      %413 = vector.load %arg9[%c0_213, %c0_214] : memref<8x128xf32, #tpu.memory_space<vmem>>, vector<8x128xf32>
      tpu.vector_store %arg9[%c0_213, %c0_214], %49 {strides = array<i32>} : memref<8x128xf32, #tpu.memory_space<vmem>>, vector<8x128xf32>,
    } else {
    }
    %c1_i32 = arith.constant 1 : i32
    %c0_36 = arith.constant 0 : index
    %c0_37 = arith.constant 0 : index
    %63 = vector.load %arg11[%c0_36, %c0_37] : memref<8x128xf32, #tpu.memory_space<vmem>>, vector<8x128xf32>
    %c0_38 = arith.constant 0 : index
    %c0_39 = arith.constant 0 : index
    %64 = vector.load %arg12[%c0_38, %c0_39] : memref<8x128xf32, #tpu.memory_space<vmem>>, vector<8x128xf32>
    %65 = arith.index_cast %c1_i32 : i32 to index
    %c0_40 = arith.constant 0 : index
    %c0_41 = arith.constant 0 : index
    %66 = vector.load %arg10[%65, %c0_40, %c0_41] : memref<8x8x512xf32, #tpu.memory_space<vmem>>, vector<1x8x512xf32>
    %67 = vector.shape_cast %66 : vector<1x8x512xf32> to vector<8x512xf32>
    %68 = arith.truncf %63 : vector<8x128xf32> to vector<8x128xbf16>
    %cst_42 = arith.constant dense<0.000000e+00> : vector<8x512xf32>
    %69 = tpu.matmul %68, %12, %cst_42 {dimension_numbers = #tpu.dot_dimension_numbers<[1], [0], [0], [1], [0, 0, 1, 1], [], []>} : vector<8x128xbf16>, vector<128x512xbf16>, vector<8x512xf32> -> vector<8x512xf32>
    %70 = arith.addf %67, %69 : vector<8x512xf32>
    %71 = vector.extract_strided_slice %70 {offsets = [0, 0], sizes = [8, 128], strides = [1, 1]} : vector<8x512xf32> to vector<8x128xf32>
    %cst_43 = arith.constant 5.000000e-01 : f32
    %72 = vector.broadcast %cst_43 : f32 to vector<8x128xf32>
    %73 = arith.mulf %72, %71 : vector<8x128xf32>
    %74 = math.tanh %73 : vector<8x128xf32>
    %cst_44 = arith.constant 1.000000e+00 : f32
    %75 = vector.broadcast %cst_44 : f32 to vector<8x128xf32>
    %76 = arith.addf %74, %75 : vector<8x128xf32>
    %cst_45 = arith.constant 5.000000e-01 : f32
    %77 = vector.broadcast %cst_45 : f32 to vector<8x128xf32>
    %78 = arith.mulf %77, %76 : vector<8x128xf32>
    %79 = vector.extract_strided_slice %70 {offsets = [0, 128], sizes = [8, 128], strides = [1, 1]} : vector<8x512xf32> to vector<8x128xf32>
    %cst_46 = arith.constant 5.000000e-01 : f32
    %80 = vector.broadcast %cst_46 : f32 to vector<8x128xf32>
    %81 = arith.mulf %80, %79 : vector<8x128xf32>
    %82 = math.tanh %81 : vector<8x128xf32>
    %cst_47 = arith.constant 1.000000e+00 : f32
    %83 = vector.broadcast %cst_47 : f32 to vector<8x128xf32>
    %84 = arith.addf %82, %83 : vector<8x128xf32>
    %cst_48 = arith.constant 5.000000e-01 : f32
    %85 = vector.broadcast %cst_48 : f32 to vector<8x128xf32>
    %86 = arith.mulf %85, %84 : vector<8x128xf32>
    %87 = vector.extract_strided_slice %70 {offsets = [0, 256], sizes = [8, 128], strides = [1, 1]} : vector<8x512xf32> to vector<8x128xf32>
    %88 = math.tanh %87 : vector<8x128xf32>
    %89 = vector.extract_strided_slice %70 {offsets = [0, 384], sizes = [8, 128], strides = [1, 1]} : vector<8x512xf32> to vector<8x128xf32>
    %cst_49 = arith.constant 5.000000e-01 : f32
    %90 = vector.broadcast %cst_49 : f32 to vector<8x128xf32>
    %91 = arith.mulf %90, %89 : vector<8x128xf32>
    %92 = math.tanh %91 : vector<8x128xf32>
    %cst_50 = arith.constant 1.000000e+00 : f32
    %93 = vector.broadcast %cst_50 : f32 to vector<8x128xf32>
    %94 = arith.addf %92, %93 : vector<8x128xf32>
    %cst_51 = arith.constant 5.000000e-01 : f32
    %95 = vector.broadcast %cst_51 : f32 to vector<8x128xf32>
    %96 = arith.mulf %95, %94 : vector<8x128xf32>
    %97 = arith.mulf %86, %64 : vector<8x128xf32>
    %98 = arith.mulf %78, %88 : vector<8x128xf32>
    %99 = arith.addf %97, %98 : vector<8x128xf32>
    %100 = math.tanh %99 : vector<8x128xf32>
    %101 = arith.mulf %96, %100 : vector<8x128xf32>
    %c0_52 = arith.constant 0 : index
    %c0_53 = arith.constant 0 : index
    %102 = vector.load %arg11[%c0_52, %c0_53] : memref<8x128xf32, #tpu.memory_space<vmem>>, vector<8x128xf32>
    tpu.vector_store %arg11[%c0_52, %c0_53], %101 {strides = array<i32>} : memref<8x128xf32, #tpu.memory_space<vmem>>, vector<8x128xf32>,
    %c0_54 = arith.constant 0 : index
    %c0_55 = arith.constant 0 : index
    %103 = vector.load %arg12[%c0_54, %c0_55] : memref<8x128xf32, #tpu.memory_space<vmem>>, vector<8x128xf32>
    tpu.vector_store %arg12[%c0_54, %c0_55], %99 {strides = array<i32>} : memref<8x128xf32, #tpu.memory_space<vmem>>, vector<8x128xf32>,
    %104 = arith.index_cast %c1_i32 : i32 to index
    %c0_56 = arith.constant 0 : index
    %c0_57 = arith.constant 0 : index
    %105 = vector.load %arg8[%104, %c0_56, %c0_57] : memref<8x8x128xf32, #tpu.memory_space<vmem>>, vector<1x8x128xf32>
    %106 = vector.shape_cast %105 : vector<1x8x128xf32> to vector<8x128xf32>
    %107 = vector.shape_cast %101 : vector<8x128xf32> to vector<1x8x128xf32>
    tpu.vector_store %arg8[%104, %c0_56, %c0_57], %107 {strides = array<i32>} : memref<8x8x128xf32, #tpu.memory_space<vmem>>, vector<1x8x128xf32>,
    %c8_i32_58 = arith.constant 8 : i32
    %108 = arith.muli %arg1, %c8_i32_58 : i32
    %109 = arith.addi %108, %c1_i32 : i32
    %c7_i32_59 = arith.constant 7 : i32
    %110 = arith.cmpi eq, %109, %c7_i32_59 : i32
    %111 = arith.extui %110 : i1 to i32
    %c0_i32_60 = arith.constant 0 : i32
    %112 = arith.cmpi ne, %111, %c0_i32_60 : i32
    scf.if %112 {
      %c0_213 = arith.constant 0 : index
      %c0_214 = arith.constant 0 : index
      %413 = vector.load %arg9[%c0_213, %c0_214] : memref<8x128xf32, #tpu.memory_space<vmem>>, vector<8x128xf32>
      tpu.vector_store %arg9[%c0_213, %c0_214], %99 {strides = array<i32>} : memref<8x128xf32, #tpu.memory_space<vmem>>, vector<8x128xf32>,
    } else {
    }
    %c2_i32 = arith.constant 2 : i32
    %c0_61 = arith.constant 0 : index
    %c0_62 = arith.constant 0 : index
    %113 = vector.load %arg11[%c0_61, %c0_62] : memref<8x128xf32, #tpu.memory_space<vmem>>, vector<8x128xf32>
    %c0_63 = arith.constant 0 : index
    %c0_64 = arith.constant 0 : index
    %114 = vector.load %arg12[%c0_63, %c0_64] : memref<8x128xf32, #tpu.memory_space<vmem>>, vector<8x128xf32>
    %115 = arith.index_cast %c2_i32 : i32 to index
    %c0_65 = arith.constant 0 : index
    %c0_66 = arith.constant 0 : index
    %116 = vector.load %arg10[%115, %c0_65, %c0_66] : memref<8x8x512xf32, #tpu.memory_space<vmem>>, vector<1x8x512xf32>
    %117 = vector.shape_cast %116 : vector<1x8x512xf32> to vector<8x512xf32>
    %118 = arith.truncf %113 : vector<8x128xf32> to vector<8x128xbf16>
    %cst_67 = arith.constant dense<0.000000e+00> : vector<8x512xf32>
    %119 = tpu.matmul %118, %12, %cst_67 {dimension_numbers = #tpu.dot_dimension_numbers<[1], [0], [0], [1], [0, 0, 1, 1], [], []>} : vector<8x128xbf16>, vector<128x512xbf16>, vector<8x512xf32> -> vector<8x512xf32>
    %120 = arith.addf %117, %119 : vector<8x512xf32>
    %121 = vector.extract_strided_slice %120 {offsets = [0, 0], sizes = [8, 128], strides = [1, 1]} : vector<8x512xf32> to vector<8x128xf32>
    %cst_68 = arith.constant 5.000000e-01 : f32
    %122 = vector.broadcast %cst_68 : f32 to vector<8x128xf32>
    %123 = arith.mulf %122, %121 : vector<8x128xf32>
    %124 = math.tanh %123 : vector<8x128xf32>
    %cst_69 = arith.constant 1.000000e+00 : f32
    %125 = vector.broadcast %cst_69 : f32 to vector<8x128xf32>
    %126 = arith.addf %124, %125 : vector<8x128xf32>
    %cst_70 = arith.constant 5.000000e-01 : f32
    %127 = vector.broadcast %cst_70 : f32 to vector<8x128xf32>
    %128 = arith.mulf %127, %126 : vector<8x128xf32>
    %129 = vector.extract_strided_slice %120 {offsets = [0, 128], sizes = [8, 128], strides = [1, 1]} : vector<8x512xf32> to vector<8x128xf32>
    %cst_71 = arith.constant 5.000000e-01 : f32
    %130 = vector.broadcast %cst_71 : f32 to vector<8x128xf32>
    %131 = arith.mulf %130, %129 : vector<8x128xf32>
    %132 = math.tanh %131 : vector<8x128xf32>
    %cst_72 = arith.constant 1.000000e+00 : f32
    %133 = vector.broadcast %cst_72 : f32 to vector<8x128xf32>
    %134 = arith.addf %132, %133 : vector<8x128xf32>
    %cst_73 = arith.constant 5.000000e-01 : f32
    %135 = vector.broadcast %cst_73 : f32 to vector<8x128xf32>
    %136 = arith.mulf %135, %134 : vector<8x128xf32>
    %137 = vector.extract_strided_slice %120 {offsets = [0, 256], sizes = [8, 128], strides = [1, 1]} : vector<8x512xf32> to vector<8x128xf32>
    %138 = math.tanh %137 : vector<8x128xf32>
    %139 = vector.extract_strided_slice %120 {offsets = [0, 384], sizes = [8, 128], strides = [1, 1]} : vector<8x512xf32> to vector<8x128xf32>
    %cst_74 = arith.constant 5.000000e-01 : f32
    %140 = vector.broadcast %cst_74 : f32 to vector<8x128xf32>
    %141 = arith.mulf %140, %139 : vector<8x128xf32>
    %142 = math.tanh %141 : vector<8x128xf32>
    %cst_75 = arith.constant 1.000000e+00 : f32
    %143 = vector.broadcast %cst_75 : f32 to vector<8x128xf32>
    %144 = arith.addf %142, %143 : vector<8x128xf32>
    %cst_76 = arith.constant 5.000000e-01 : f32
    %145 = vector.broadcast %cst_76 : f32 to vector<8x128xf32>
    %146 = arith.mulf %145, %144 : vector<8x128xf32>
    %147 = arith.mulf %136, %114 : vector<8x128xf32>
    %148 = arith.mulf %128, %138 : vector<8x128xf32>
    %149 = arith.addf %147, %148 : vector<8x128xf32>
    %150 = math.tanh %149 : vector<8x128xf32>
    %151 = arith.mulf %146, %150 : vector<8x128xf32>
    %c0_77 = arith.constant 0 : index
    %c0_78 = arith.constant 0 : index
    %152 = vector.load %arg11[%c0_77, %c0_78] : memref<8x128xf32, #tpu.memory_space<vmem>>, vector<8x128xf32>
    tpu.vector_store %arg11[%c0_77, %c0_78], %151 {strides = array<i32>} : memref<8x128xf32, #tpu.memory_space<vmem>>, vector<8x128xf32>,
    %c0_79 = arith.constant 0 : index
    %c0_80 = arith.constant 0 : index
    %153 = vector.load %arg12[%c0_79, %c0_80] : memref<8x128xf32, #tpu.memory_space<vmem>>, vector<8x128xf32>
    tpu.vector_store %arg12[%c0_79, %c0_80], %149 {strides = array<i32>} : memref<8x128xf32, #tpu.memory_space<vmem>>, vector<8x128xf32>,
    %154 = arith.index_cast %c2_i32 : i32 to index
    %c0_81 = arith.constant 0 : index
    %c0_82 = arith.constant 0 : index
    %155 = vector.load %arg8[%154, %c0_81, %c0_82] : memref<8x8x128xf32, #tpu.memory_space<vmem>>, vector<1x8x128xf32>
    %156 = vector.shape_cast %155 : vector<1x8x128xf32> to vector<8x128xf32>
    %157 = vector.shape_cast %151 : vector<8x128xf32> to vector<1x8x128xf32>
    tpu.vector_store %arg8[%154, %c0_81, %c0_82], %157 {strides = array<i32>} : memref<8x8x128xf32, #tpu.memory_space<vmem>>, vector<1x8x128xf32>,
    %c8_i32_83 = arith.constant 8 : i32
    %158 = arith.muli %arg1, %c8_i32_83 : i32
    %159 = arith.addi %158, %c2_i32 : i32
    %c7_i32_84 = arith.constant 7 : i32
    %160 = arith.cmpi eq, %159, %c7_i32_84 : i32
    %161 = arith.extui %160 : i1 to i32
    %c0_i32_85 = arith.constant 0 : i32
    %162 = arith.cmpi ne, %161, %c0_i32_85 : i32
    scf.if %162 {
      %c0_213 = arith.constant 0 : index
      %c0_214 = arith.constant 0 : index
      %413 = vector.load %arg9[%c0_213, %c0_214] : memref<8x128xf32, #tpu.memory_space<vmem>>, vector<8x128xf32>
      tpu.vector_store %arg9[%c0_213, %c0_214], %149 {strides = array<i32>} : memref<8x128xf32, #tpu.memory_space<vmem>>, vector<8x128xf32>,
    } else {
    }
    %c3_i32 = arith.constant 3 : i32
    %c0_86 = arith.constant 0 : index
    %c0_87 = arith.constant 0 : index
    %163 = vector.load %arg11[%c0_86, %c0_87] : memref<8x128xf32, #tpu.memory_space<vmem>>, vector<8x128xf32>
    %c0_88 = arith.constant 0 : index
    %c0_89 = arith.constant 0 : index
    %164 = vector.load %arg12[%c0_88, %c0_89] : memref<8x128xf32, #tpu.memory_space<vmem>>, vector<8x128xf32>
    %165 = arith.index_cast %c3_i32 : i32 to index
    %c0_90 = arith.constant 0 : index
    %c0_91 = arith.constant 0 : index
    %166 = vector.load %arg10[%165, %c0_90, %c0_91] : memref<8x8x512xf32, #tpu.memory_space<vmem>>, vector<1x8x512xf32>
    %167 = vector.shape_cast %166 : vector<1x8x512xf32> to vector<8x512xf32>
    %168 = arith.truncf %163 : vector<8x128xf32> to vector<8x128xbf16>
    %cst_92 = arith.constant dense<0.000000e+00> : vector<8x512xf32>
    %169 = tpu.matmul %168, %12, %cst_92 {dimension_numbers = #tpu.dot_dimension_numbers<[1], [0], [0], [1], [0, 0, 1, 1], [], []>} : vector<8x128xbf16>, vector<128x512xbf16>, vector<8x512xf32> -> vector<8x512xf32>
    %170 = arith.addf %167, %169 : vector<8x512xf32>
    %171 = vector.extract_strided_slice %170 {offsets = [0, 0], sizes = [8, 128], strides = [1, 1]} : vector<8x512xf32> to vector<8x128xf32>
    %cst_93 = arith.constant 5.000000e-01 : f32
    %172 = vector.broadcast %cst_93 : f32 to vector<8x128xf32>
    %173 = arith.mulf %172, %171 : vector<8x128xf32>
    %174 = math.tanh %173 : vector<8x128xf32>
    %cst_94 = arith.constant 1.000000e+00 : f32
    %175 = vector.broadcast %cst_94 : f32 to vector<8x128xf32>
    %176 = arith.addf %174, %175 : vector<8x128xf32>
    %cst_95 = arith.constant 5.000000e-01 : f32
    %177 = vector.broadcast %cst_95 : f32 to vector<8x128xf32>
    %178 = arith.mulf %177, %176 : vector<8x128xf32>
    %179 = vector.extract_strided_slice %170 {offsets = [0, 128], sizes = [8, 128], strides = [1, 1]} : vector<8x512xf32> to vector<8x128xf32>
    %cst_96 = arith.constant 5.000000e-01 : f32
    %180 = vector.broadcast %cst_96 : f32 to vector<8x128xf32>
    %181 = arith.mulf %180, %179 : vector<8x128xf32>
    %182 = math.tanh %181 : vector<8x128xf32>
    %cst_97 = arith.constant 1.000000e+00 : f32
    %183 = vector.broadcast %cst_97 : f32 to vector<8x128xf32>
    %184 = arith.addf %182, %183 : vector<8x128xf32>
    %cst_98 = arith.constant 5.000000e-01 : f32
    %185 = vector.broadcast %cst_98 : f32 to vector<8x128xf32>
    %186 = arith.mulf %185, %184 : vector<8x128xf32>
    %187 = vector.extract_strided_slice %170 {offsets = [0, 256], sizes = [8, 128], strides = [1, 1]} : vector<8x512xf32> to vector<8x128xf32>
    %188 = math.tanh %187 : vector<8x128xf32>
    %189 = vector.extract_strided_slice %170 {offsets = [0, 384], sizes = [8, 128], strides = [1, 1]} : vector<8x512xf32> to vector<8x128xf32>
    %cst_99 = arith.constant 5.000000e-01 : f32
    %190 = vector.broadcast %cst_99 : f32 to vector<8x128xf32>
    %191 = arith.mulf %190, %189 : vector<8x128xf32>
    %192 = math.tanh %191 : vector<8x128xf32>
    %cst_100 = arith.constant 1.000000e+00 : f32
    %193 = vector.broadcast %cst_100 : f32 to vector<8x128xf32>
    %194 = arith.addf %192, %193 : vector<8x128xf32>
    %cst_101 = arith.constant 5.000000e-01 : f32
    %195 = vector.broadcast %cst_101 : f32 to vector<8x128xf32>
    %196 = arith.mulf %195, %194 : vector<8x128xf32>
    %197 = arith.mulf %186, %164 : vector<8x128xf32>
    %198 = arith.mulf %178, %188 : vector<8x128xf32>
    %199 = arith.addf %197, %198 : vector<8x128xf32>
    %200 = math.tanh %199 : vector<8x128xf32>
    %201 = arith.mulf %196, %200 : vector<8x128xf32>
    %c0_102 = arith.constant 0 : index
    %c0_103 = arith.constant 0 : index
    %202 = vector.load %arg11[%c0_102, %c0_103] : memref<8x128xf32, #tpu.memory_space<vmem>>, vector<8x128xf32>
    tpu.vector_store %arg11[%c0_102, %c0_103], %201 {strides = array<i32>} : memref<8x128xf32, #tpu.memory_space<vmem>>, vector<8x128xf32>,
    %c0_104 = arith.constant 0 : index
    %c0_105 = arith.constant 0 : index
    %203 = vector.load %arg12[%c0_104, %c0_105] : memref<8x128xf32, #tpu.memory_space<vmem>>, vector<8x128xf32>
    tpu.vector_store %arg12[%c0_104, %c0_105], %199 {strides = array<i32>} : memref<8x128xf32, #tpu.memory_space<vmem>>, vector<8x128xf32>,
    %204 = arith.index_cast %c3_i32 : i32 to index
    %c0_106 = arith.constant 0 : index
    %c0_107 = arith.constant 0 : index
    %205 = vector.load %arg8[%204, %c0_106, %c0_107] : memref<8x8x128xf32, #tpu.memory_space<vmem>>, vector<1x8x128xf32>
    %206 = vector.shape_cast %205 : vector<1x8x128xf32> to vector<8x128xf32>
    %207 = vector.shape_cast %201 : vector<8x128xf32> to vector<1x8x128xf32>
    tpu.vector_store %arg8[%204, %c0_106, %c0_107], %207 {strides = array<i32>} : memref<8x8x128xf32, #tpu.memory_space<vmem>>, vector<1x8x128xf32>,
    %c8_i32_108 = arith.constant 8 : i32
    %208 = arith.muli %arg1, %c8_i32_108 : i32
    %209 = arith.addi %208, %c3_i32 : i32
    %c7_i32_109 = arith.constant 7 : i32
    %210 = arith.cmpi eq, %209, %c7_i32_109 : i32
    %211 = arith.extui %210 : i1 to i32
    %c0_i32_110 = arith.constant 0 : i32
    %212 = arith.cmpi ne, %211, %c0_i32_110 : i32
    scf.if %212 {
      %c0_213 = arith.constant 0 : index
      %c0_214 = arith.constant 0 : index
      %413 = vector.load %arg9[%c0_213, %c0_214] : memref<8x128xf32, #tpu.memory_space<vmem>>, vector<8x128xf32>
      tpu.vector_store %arg9[%c0_213, %c0_214], %199 {strides = array<i32>} : memref<8x128xf32, #tpu.memory_space<vmem>>, vector<8x128xf32>,
    } else {
    }
    %c4_i32 = arith.constant 4 : i32
    %c0_111 = arith.constant 0 : index
    %c0_112 = arith.constant 0 : index
    %213 = vector.load %arg11[%c0_111, %c0_112] : memref<8x128xf32, #tpu.memory_space<vmem>>, vector<8x128xf32>
    %c0_113 = arith.constant 0 : index
    %c0_114 = arith.constant 0 : index
    %214 = vector.load %arg12[%c0_113, %c0_114] : memref<8x128xf32, #tpu.memory_space<vmem>>, vector<8x128xf32>
    %215 = arith.index_cast %c4_i32 : i32 to index
    %c0_115 = arith.constant 0 : index
    %c0_116 = arith.constant 0 : index
    %216 = vector.load %arg10[%215, %c0_115, %c0_116] : memref<8x8x512xf32, #tpu.memory_space<vmem>>, vector<1x8x512xf32>
    %217 = vector.shape_cast %216 : vector<1x8x512xf32> to vector<8x512xf32>
    %218 = arith.truncf %213 : vector<8x128xf32> to vector<8x128xbf16>
    %cst_117 = arith.constant dense<0.000000e+00> : vector<8x512xf32>
    %219 = tpu.matmul %218, %12, %cst_117 {dimension_numbers = #tpu.dot_dimension_numbers<[1], [0], [0], [1], [0, 0, 1, 1], [], []>} : vector<8x128xbf16>, vector<128x512xbf16>, vector<8x512xf32> -> vector<8x512xf32>
    %220 = arith.addf %217, %219 : vector<8x512xf32>
    %221 = vector.extract_strided_slice %220 {offsets = [0, 0], sizes = [8, 128], strides = [1, 1]} : vector<8x512xf32> to vector<8x128xf32>
    %cst_118 = arith.constant 5.000000e-01 : f32
    %222 = vector.broadcast %cst_118 : f32 to vector<8x128xf32>
    %223 = arith.mulf %222, %221 : vector<8x128xf32>
    %224 = math.tanh %223 : vector<8x128xf32>
    %cst_119 = arith.constant 1.000000e+00 : f32
    %225 = vector.broadcast %cst_119 : f32 to vector<8x128xf32>
    %226 = arith.addf %224, %225 : vector<8x128xf32>
    %cst_120 = arith.constant 5.000000e-01 : f32
    %227 = vector.broadcast %cst_120 : f32 to vector<8x128xf32>
    %228 = arith.mulf %227, %226 : vector<8x128xf32>
    %229 = vector.extract_strided_slice %220 {offsets = [0, 128], sizes = [8, 128], strides = [1, 1]} : vector<8x512xf32> to vector<8x128xf32>
    %cst_121 = arith.constant 5.000000e-01 : f32
    %230 = vector.broadcast %cst_121 : f32 to vector<8x128xf32>
    %231 = arith.mulf %230, %229 : vector<8x128xf32>
    %232 = math.tanh %231 : vector<8x128xf32>
    %cst_122 = arith.constant 1.000000e+00 : f32
    %233 = vector.broadcast %cst_122 : f32 to vector<8x128xf32>
    %234 = arith.addf %232, %233 : vector<8x128xf32>
    %cst_123 = arith.constant 5.000000e-01 : f32
    %235 = vector.broadcast %cst_123 : f32 to vector<8x128xf32>
    %236 = arith.mulf %235, %234 : vector<8x128xf32>
    %237 = vector.extract_strided_slice %220 {offsets = [0, 256], sizes = [8, 128], strides = [1, 1]} : vector<8x512xf32> to vector<8x128xf32>
    %238 = math.tanh %237 : vector<8x128xf32>
    %239 = vector.extract_strided_slice %220 {offsets = [0, 384], sizes = [8, 128], strides = [1, 1]} : vector<8x512xf32> to vector<8x128xf32>
    %cst_124 = arith.constant 5.000000e-01 : f32
    %240 = vector.broadcast %cst_124 : f32 to vector<8x128xf32>
    %241 = arith.mulf %240, %239 : vector<8x128xf32>
    %242 = math.tanh %241 : vector<8x128xf32>
    %cst_125 = arith.constant 1.000000e+00 : f32
    %243 = vector.broadcast %cst_125 : f32 to vector<8x128xf32>
    %244 = arith.addf %242, %243 : vector<8x128xf32>
    %cst_126 = arith.constant 5.000000e-01 : f32
    %245 = vector.broadcast %cst_126 : f32 to vector<8x128xf32>
    %246 = arith.mulf %245, %244 : vector<8x128xf32>
    %247 = arith.mulf %236, %214 : vector<8x128xf32>
    %248 = arith.mulf %228, %238 : vector<8x128xf32>
    %249 = arith.addf %247, %248 : vector<8x128xf32>
    %250 = math.tanh %249 : vector<8x128xf32>
    %251 = arith.mulf %246, %250 : vector<8x128xf32>
    %c0_127 = arith.constant 0 : index
    %c0_128 = arith.constant 0 : index
    %252 = vector.load %arg11[%c0_127, %c0_128] : memref<8x128xf32, #tpu.memory_space<vmem>>, vector<8x128xf32>
    tpu.vector_store %arg11[%c0_127, %c0_128], %251 {strides = array<i32>} : memref<8x128xf32, #tpu.memory_space<vmem>>, vector<8x128xf32>,
    %c0_129 = arith.constant 0 : index
    %c0_130 = arith.constant 0 : index
    %253 = vector.load %arg12[%c0_129, %c0_130] : memref<8x128xf32, #tpu.memory_space<vmem>>, vector<8x128xf32>
    tpu.vector_store %arg12[%c0_129, %c0_130], %249 {strides = array<i32>} : memref<8x128xf32, #tpu.memory_space<vmem>>, vector<8x128xf32>,
    %254 = arith.index_cast %c4_i32 : i32 to index
    %c0_131 = arith.constant 0 : index
    %c0_132 = arith.constant 0 : index
    %255 = vector.load %arg8[%254, %c0_131, %c0_132] : memref<8x8x128xf32, #tpu.memory_space<vmem>>, vector<1x8x128xf32>
    %256 = vector.shape_cast %255 : vector<1x8x128xf32> to vector<8x128xf32>
    %257 = vector.shape_cast %251 : vector<8x128xf32> to vector<1x8x128xf32>
    tpu.vector_store %arg8[%254, %c0_131, %c0_132], %257 {strides = array<i32>} : memref<8x8x128xf32, #tpu.memory_space<vmem>>, vector<1x8x128xf32>,
    %c8_i32_133 = arith.constant 8 : i32
    %258 = arith.muli %arg1, %c8_i32_133 : i32
    %259 = arith.addi %258, %c4_i32 : i32
    %c7_i32_134 = arith.constant 7 : i32
    %260 = arith.cmpi eq, %259, %c7_i32_134 : i32
    %261 = arith.extui %260 : i1 to i32
    %c0_i32_135 = arith.constant 0 : i32
    %262 = arith.cmpi ne, %261, %c0_i32_135 : i32
    scf.if %262 {
      %c0_213 = arith.constant 0 : index
      %c0_214 = arith.constant 0 : index
      %413 = vector.load %arg9[%c0_213, %c0_214] : memref<8x128xf32, #tpu.memory_space<vmem>>, vector<8x128xf32>
      tpu.vector_store %arg9[%c0_213, %c0_214], %249 {strides = array<i32>} : memref<8x128xf32, #tpu.memory_space<vmem>>, vector<8x128xf32>,
    } else {
    }
    %c5_i32 = arith.constant 5 : i32
    %c0_136 = arith.constant 0 : index
    %c0_137 = arith.constant 0 : index
    %263 = vector.load %arg11[%c0_136, %c0_137] : memref<8x128xf32, #tpu.memory_space<vmem>>, vector<8x128xf32>
    %c0_138 = arith.constant 0 : index
    %c0_139 = arith.constant 0 : index
    %264 = vector.load %arg12[%c0_138, %c0_139] : memref<8x128xf32, #tpu.memory_space<vmem>>, vector<8x128xf32>
    %265 = arith.index_cast %c5_i32 : i32 to index
    %c0_140 = arith.constant 0 : index
    %c0_141 = arith.constant 0 : index
    %266 = vector.load %arg10[%265, %c0_140, %c0_141] : memref<8x8x512xf32, #tpu.memory_space<vmem>>, vector<1x8x512xf32>
    %267 = vector.shape_cast %266 : vector<1x8x512xf32> to vector<8x512xf32>
    %268 = arith.truncf %263 : vector<8x128xf32> to vector<8x128xbf16>
    %cst_142 = arith.constant dense<0.000000e+00> : vector<8x512xf32>
    %269 = tpu.matmul %268, %12, %cst_142 {dimension_numbers = #tpu.dot_dimension_numbers<[1], [0], [0], [1], [0, 0, 1, 1], [], []>} : vector<8x128xbf16>, vector<128x512xbf16>, vector<8x512xf32> -> vector<8x512xf32>
    %270 = arith.addf %267, %269 : vector<8x512xf32>
    %271 = vector.extract_strided_slice %270 {offsets = [0, 0], sizes = [8, 128], strides = [1, 1]} : vector<8x512xf32> to vector<8x128xf32>
    %cst_143 = arith.constant 5.000000e-01 : f32
    %272 = vector.broadcast %cst_143 : f32 to vector<8x128xf32>
    %273 = arith.mulf %272, %271 : vector<8x128xf32>
    %274 = math.tanh %273 : vector<8x128xf32>
    %cst_144 = arith.constant 1.000000e+00 : f32
    %275 = vector.broadcast %cst_144 : f32 to vector<8x128xf32>
    %276 = arith.addf %274, %275 : vector<8x128xf32>
    %cst_145 = arith.constant 5.000000e-01 : f32
    %277 = vector.broadcast %cst_145 : f32 to vector<8x128xf32>
    %278 = arith.mulf %277, %276 : vector<8x128xf32>
    %279 = vector.extract_strided_slice %270 {offsets = [0, 128], sizes = [8, 128], strides = [1, 1]} : vector<8x512xf32> to vector<8x128xf32>
    %cst_146 = arith.constant 5.000000e-01 : f32
    %280 = vector.broadcast %cst_146 : f32 to vector<8x128xf32>
    %281 = arith.mulf %280, %279 : vector<8x128xf32>
    %282 = math.tanh %281 : vector<8x128xf32>
    %cst_147 = arith.constant 1.000000e+00 : f32
    %283 = vector.broadcast %cst_147 : f32 to vector<8x128xf32>
    %284 = arith.addf %282, %283 : vector<8x128xf32>
    %cst_148 = arith.constant 5.000000e-01 : f32
    %285 = vector.broadcast %cst_148 : f32 to vector<8x128xf32>
    %286 = arith.mulf %285, %284 : vector<8x128xf32>
    %287 = vector.extract_strided_slice %270 {offsets = [0, 256], sizes = [8, 128], strides = [1, 1]} : vector<8x512xf32> to vector<8x128xf32>
    %288 = math.tanh %287 : vector<8x128xf32>
    %289 = vector.extract_strided_slice %270 {offsets = [0, 384], sizes = [8, 128], strides = [1, 1]} : vector<8x512xf32> to vector<8x128xf32>
    %cst_149 = arith.constant 5.000000e-01 : f32
    %290 = vector.broadcast %cst_149 : f32 to vector<8x128xf32>
    %291 = arith.mulf %290, %289 : vector<8x128xf32>
    %292 = math.tanh %291 : vector<8x128xf32>
    %cst_150 = arith.constant 1.000000e+00 : f32
    %293 = vector.broadcast %cst_150 : f32 to vector<8x128xf32>
    %294 = arith.addf %292, %293 : vector<8x128xf32>
    %cst_151 = arith.constant 5.000000e-01 : f32
    %295 = vector.broadcast %cst_151 : f32 to vector<8x128xf32>
    %296 = arith.mulf %295, %294 : vector<8x128xf32>
    %297 = arith.mulf %286, %264 : vector<8x128xf32>
    %298 = arith.mulf %278, %288 : vector<8x128xf32>
    %299 = arith.addf %297, %298 : vector<8x128xf32>
    %300 = math.tanh %299 : vector<8x128xf32>
    %301 = arith.mulf %296, %300 : vector<8x128xf32>
    %c0_152 = arith.constant 0 : index
    %c0_153 = arith.constant 0 : index
    %302 = vector.load %arg11[%c0_152, %c0_153] : memref<8x128xf32, #tpu.memory_space<vmem>>, vector<8x128xf32>
    tpu.vector_store %arg11[%c0_152, %c0_153], %301 {strides = array<i32>} : memref<8x128xf32, #tpu.memory_space<vmem>>, vector<8x128xf32>,
    %c0_154 = arith.constant 0 : index
    %c0_155 = arith.constant 0 : index
    %303 = vector.load %arg12[%c0_154, %c0_155] : memref<8x128xf32, #tpu.memory_space<vmem>>, vector<8x128xf32>
    tpu.vector_store %arg12[%c0_154, %c0_155], %299 {strides = array<i32>} : memref<8x128xf32, #tpu.memory_space<vmem>>, vector<8x128xf32>,
    %304 = arith.index_cast %c5_i32 : i32 to index
    %c0_156 = arith.constant 0 : index
    %c0_157 = arith.constant 0 : index
    %305 = vector.load %arg8[%304, %c0_156, %c0_157] : memref<8x8x128xf32, #tpu.memory_space<vmem>>, vector<1x8x128xf32>
    %306 = vector.shape_cast %305 : vector<1x8x128xf32> to vector<8x128xf32>
    %307 = vector.shape_cast %301 : vector<8x128xf32> to vector<1x8x128xf32>
    tpu.vector_store %arg8[%304, %c0_156, %c0_157], %307 {strides = array<i32>} : memref<8x8x128xf32, #tpu.memory_space<vmem>>, vector<1x8x128xf32>,
    %c8_i32_158 = arith.constant 8 : i32
    %308 = arith.muli %arg1, %c8_i32_158 : i32
    %309 = arith.addi %308, %c5_i32 : i32
    %c7_i32_159 = arith.constant 7 : i32
    %310 = arith.cmpi eq, %309, %c7_i32_159 : i32
    %311 = arith.extui %310 : i1 to i32
    %c0_i32_160 = arith.constant 0 : i32
    %312 = arith.cmpi ne, %311, %c0_i32_160 : i32
    scf.if %312 {
      %c0_213 = arith.constant 0 : index
      %c0_214 = arith.constant 0 : index
      %413 = vector.load %arg9[%c0_213, %c0_214] : memref<8x128xf32, #tpu.memory_space<vmem>>, vector<8x128xf32>
      tpu.vector_store %arg9[%c0_213, %c0_214], %299 {strides = array<i32>} : memref<8x128xf32, #tpu.memory_space<vmem>>, vector<8x128xf32>,
    } else {
    }
    %c6_i32 = arith.constant 6 : i32
    %c0_161 = arith.constant 0 : index
    %c0_162 = arith.constant 0 : index
    %313 = vector.load %arg11[%c0_161, %c0_162] : memref<8x128xf32, #tpu.memory_space<vmem>>, vector<8x128xf32>
    %c0_163 = arith.constant 0 : index
    %c0_164 = arith.constant 0 : index
    %314 = vector.load %arg12[%c0_163, %c0_164] : memref<8x128xf32, #tpu.memory_space<vmem>>, vector<8x128xf32>
    %315 = arith.index_cast %c6_i32 : i32 to index
    %c0_165 = arith.constant 0 : index
    %c0_166 = arith.constant 0 : index
    %316 = vector.load %arg10[%315, %c0_165, %c0_166] : memref<8x8x512xf32, #tpu.memory_space<vmem>>, vector<1x8x512xf32>
    %317 = vector.shape_cast %316 : vector<1x8x512xf32> to vector<8x512xf32>
    %318 = arith.truncf %313 : vector<8x128xf32> to vector<8x128xbf16>
    %cst_167 = arith.constant dense<0.000000e+00> : vector<8x512xf32>
    %319 = tpu.matmul %318, %12, %cst_167 {dimension_numbers = #tpu.dot_dimension_numbers<[1], [0], [0], [1], [0, 0, 1, 1], [], []>} : vector<8x128xbf16>, vector<128x512xbf16>, vector<8x512xf32> -> vector<8x512xf32>
    %320 = arith.addf %317, %319 : vector<8x512xf32>
    %321 = vector.extract_strided_slice %320 {offsets = [0, 0], sizes = [8, 128], strides = [1, 1]} : vector<8x512xf32> to vector<8x128xf32>
    %cst_168 = arith.constant 5.000000e-01 : f32
    %322 = vector.broadcast %cst_168 : f32 to vector<8x128xf32>
    %323 = arith.mulf %322, %321 : vector<8x128xf32>
    %324 = math.tanh %323 : vector<8x128xf32>
    %cst_169 = arith.constant 1.000000e+00 : f32
    %325 = vector.broadcast %cst_169 : f32 to vector<8x128xf32>
    %326 = arith.addf %324, %325 : vector<8x128xf32>
    %cst_170 = arith.constant 5.000000e-01 : f32
    %327 = vector.broadcast %cst_170 : f32 to vector<8x128xf32>
    %328 = arith.mulf %327, %326 : vector<8x128xf32>
    %329 = vector.extract_strided_slice %320 {offsets = [0, 128], sizes = [8, 128], strides = [1, 1]} : vector<8x512xf32> to vector<8x128xf32>
    %cst_171 = arith.constant 5.000000e-01 : f32
    %330 = vector.broadcast %cst_171 : f32 to vector<8x128xf32>
    %331 = arith.mulf %330, %329 : vector<8x128xf32>
    %332 = math.tanh %331 : vector<8x128xf32>
    %cst_172 = arith.constant 1.000000e+00 : f32
    %333 = vector.broadcast %cst_172 : f32 to vector<8x128xf32>
    %334 = arith.addf %332, %333 : vector<8x128xf32>
    %cst_173 = arith.constant 5.000000e-01 : f32
    %335 = vector.broadcast %cst_173 : f32 to vector<8x128xf32>
    %336 = arith.mulf %335, %334 : vector<8x128xf32>
    %337 = vector.extract_strided_slice %320 {offsets = [0, 256], sizes = [8, 128], strides = [1, 1]} : vector<8x512xf32> to vector<8x128xf32>
    %338 = math.tanh %337 : vector<8x128xf32>
    %339 = vector.extract_strided_slice %320 {offsets = [0, 384], sizes = [8, 128], strides = [1, 1]} : vector<8x512xf32> to vector<8x128xf32>
    %cst_174 = arith.constant 5.000000e-01 : f32
    %340 = vector.broadcast %cst_174 : f32 to vector<8x128xf32>
    %341 = arith.mulf %340, %339 : vector<8x128xf32>
    %342 = math.tanh %341 : vector<8x128xf32>
    %cst_175 = arith.constant 1.000000e+00 : f32
    %343 = vector.broadcast %cst_175 : f32 to vector<8x128xf32>
    %344 = arith.addf %342, %343 : vector<8x128xf32>
    %cst_176 = arith.constant 5.000000e-01 : f32
    %345 = vector.broadcast %cst_176 : f32 to vector<8x128xf32>
    %346 = arith.mulf %345, %344 : vector<8x128xf32>
    %347 = arith.mulf %336, %314 : vector<8x128xf32>
    %348 = arith.mulf %328, %338 : vector<8x128xf32>
    %349 = arith.addf %347, %348 : vector<8x128xf32>
    %350 = math.tanh %349 : vector<8x128xf32>
    %351 = arith.mulf %346, %350 : vector<8x128xf32>
    %c0_177 = arith.constant 0 : index
    %c0_178 = arith.constant 0 : index
    %352 = vector.load %arg11[%c0_177, %c0_178] : memref<8x128xf32, #tpu.memory_space<vmem>>, vector<8x128xf32>
    tpu.vector_store %arg11[%c0_177, %c0_178], %351 {strides = array<i32>} : memref<8x128xf32, #tpu.memory_space<vmem>>, vector<8x128xf32>,
    %c0_179 = arith.constant 0 : index
    %c0_180 = arith.constant 0 : index
    %353 = vector.load %arg12[%c0_179, %c0_180] : memref<8x128xf32, #tpu.memory_space<vmem>>, vector<8x128xf32>
    tpu.vector_store %arg12[%c0_179, %c0_180], %349 {strides = array<i32>} : memref<8x128xf32, #tpu.memory_space<vmem>>, vector<8x128xf32>,
    %354 = arith.index_cast %c6_i32 : i32 to index
    %c0_181 = arith.constant 0 : index
    %c0_182 = arith.constant 0 : index
    %355 = vector.load %arg8[%354, %c0_181, %c0_182] : memref<8x8x128xf32, #tpu.memory_space<vmem>>, vector<1x8x128xf32>
    %356 = vector.shape_cast %355 : vector<1x8x128xf32> to vector<8x128xf32>
    %357 = vector.shape_cast %351 : vector<8x128xf32> to vector<1x8x128xf32>
    tpu.vector_store %arg8[%354, %c0_181, %c0_182], %357 {strides = array<i32>} : memref<8x8x128xf32, #tpu.memory_space<vmem>>, vector<1x8x128xf32>,
    %c8_i32_183 = arith.constant 8 : i32
    %358 = arith.muli %arg1, %c8_i32_183 : i32
    %359 = arith.addi %358, %c6_i32 : i32
    %c7_i32_184 = arith.constant 7 : i32
    %360 = arith.cmpi eq, %359, %c7_i32_184 : i32
    %361 = arith.extui %360 : i1 to i32
    %c0_i32_185 = arith.constant 0 : i32
    %362 = arith.cmpi ne, %361, %c0_i32_185 : i32
    scf.if %362 {
      %c0_213 = arith.constant 0 : index
      %c0_214 = arith.constant 0 : index
      %413 = vector.load %arg9[%c0_213, %c0_214] : memref<8x128xf32, #tpu.memory_space<vmem>>, vector<8x128xf32>
      tpu.vector_store %arg9[%c0_213, %c0_214], %349 {strides = array<i32>} : memref<8x128xf32, #tpu.memory_space<vmem>>, vector<8x128xf32>,
    } else {
    }
    %c7_i32_186 = arith.constant 7 : i32
    %c0_187 = arith.constant 0 : index
    %c0_188 = arith.constant 0 : index
    %363 = vector.load %arg11[%c0_187, %c0_188] : memref<8x128xf32, #tpu.memory_space<vmem>>, vector<8x128xf32>
    %c0_189 = arith.constant 0 : index
    %c0_190 = arith.constant 0 : index
    %364 = vector.load %arg12[%c0_189, %c0_190] : memref<8x128xf32, #tpu.memory_space<vmem>>, vector<8x128xf32>
    %365 = arith.index_cast %c7_i32_186 : i32 to index
    %c0_191 = arith.constant 0 : index
    %c0_192 = arith.constant 0 : index
    %366 = vector.load %arg10[%365, %c0_191, %c0_192] : memref<8x8x512xf32, #tpu.memory_space<vmem>>, vector<1x8x512xf32>
    %367 = vector.shape_cast %366 : vector<1x8x512xf32> to vector<8x512xf32>
    %368 = arith.truncf %363 : vector<8x128xf32> to vector<8x128xbf16>
    %cst_193 = arith.constant dense<0.000000e+00> : vector<8x512xf32>
    %369 = tpu.matmul %368, %12, %cst_193 {dimension_numbers = #tpu.dot_dimension_numbers<[1], [0], [0], [1], [0, 0, 1, 1], [], []>} : vector<8x128xbf16>, vector<128x512xbf16>, vector<8x512xf32> -> vector<8x512xf32>
    %370 = arith.addf %367, %369 : vector<8x512xf32>
    %371 = vector.extract_strided_slice %370 {offsets = [0, 0], sizes = [8, 128], strides = [1, 1]} : vector<8x512xf32> to vector<8x128xf32>
    %cst_194 = arith.constant 5.000000e-01 : f32
    %372 = vector.broadcast %cst_194 : f32 to vector<8x128xf32>
    %373 = arith.mulf %372, %371 : vector<8x128xf32>
    %374 = math.tanh %373 : vector<8x128xf32>
    %cst_195 = arith.constant 1.000000e+00 : f32
    %375 = vector.broadcast %cst_195 : f32 to vector<8x128xf32>
    %376 = arith.addf %374, %375 : vector<8x128xf32>
    %cst_196 = arith.constant 5.000000e-01 : f32
    %377 = vector.broadcast %cst_196 : f32 to vector<8x128xf32>
    %378 = arith.mulf %377, %376 : vector<8x128xf32>
    %379 = vector.extract_strided_slice %370 {offsets = [0, 128], sizes = [8, 128], strides = [1, 1]} : vector<8x512xf32> to vector<8x128xf32>
    %cst_197 = arith.constant 5.000000e-01 : f32
    %380 = vector.broadcast %cst_197 : f32 to vector<8x128xf32>
    %381 = arith.mulf %380, %379 : vector<8x128xf32>
    %382 = math.tanh %381 : vector<8x128xf32>
    %cst_198 = arith.constant 1.000000e+00 : f32
    %383 = vector.broadcast %cst_198 : f32 to vector<8x128xf32>
    %384 = arith.addf %382, %383 : vector<8x128xf32>
    %cst_199 = arith.constant 5.000000e-01 : f32
    %385 = vector.broadcast %cst_199 : f32 to vector<8x128xf32>
    %386 = arith.mulf %385, %384 : vector<8x128xf32>
    %387 = vector.extract_strided_slice %370 {offsets = [0, 256], sizes = [8, 128], strides = [1, 1]} : vector<8x512xf32> to vector<8x128xf32>
    %388 = math.tanh %387 : vector<8x128xf32>
    %389 = vector.extract_strided_slice %370 {offsets = [0, 384], sizes = [8, 128], strides = [1, 1]} : vector<8x512xf32> to vector<8x128xf32>
    %cst_200 = arith.constant 5.000000e-01 : f32
    %390 = vector.broadcast %cst_200 : f32 to vector<8x128xf32>
    %391 = arith.mulf %390, %389 : vector<8x128xf32>
    %392 = math.tanh %391 : vector<8x128xf32>
    %cst_201 = arith.constant 1.000000e+00 : f32
    %393 = vector.broadcast %cst_201 : f32 to vector<8x128xf32>
    %394 = arith.addf %392, %393 : vector<8x128xf32>
    %cst_202 = arith.constant 5.000000e-01 : f32
    %395 = vector.broadcast %cst_202 : f32 to vector<8x128xf32>
    %396 = arith.mulf %395, %394 : vector<8x128xf32>
    %397 = arith.mulf %386, %364 : vector<8x128xf32>
    %398 = arith.mulf %378, %388 : vector<8x128xf32>
    %399 = arith.addf %397, %398 : vector<8x128xf32>
    %400 = math.tanh %399 : vector<8x128xf32>
    %401 = arith.mulf %396, %400 : vector<8x128xf32>
    %c0_203 = arith.constant 0 : index
    %c0_204 = arith.constant 0 : index
    %402 = vector.load %arg11[%c0_203, %c0_204] : memref<8x128xf32, #tpu.memory_space<vmem>>, vector<8x128xf32>
    tpu.vector_store %arg11[%c0_203, %c0_204], %401 {strides = array<i32>} : memref<8x128xf32, #tpu.memory_space<vmem>>, vector<8x128xf32>,
    %c0_205 = arith.constant 0 : index
    %c0_206 = arith.constant 0 : index
    %403 = vector.load %arg12[%c0_205, %c0_206] : memref<8x128xf32, #tpu.memory_space<vmem>>, vector<8x128xf32>
    tpu.vector_store %arg12[%c0_205, %c0_206], %399 {strides = array<i32>} : memref<8x128xf32, #tpu.memory_space<vmem>>, vector<8x128xf32>,
    %404 = arith.index_cast %c7_i32_186 : i32 to index
    %c0_207 = arith.constant 0 : index
    %c0_208 = arith.constant 0 : index
    %405 = vector.load %arg8[%404, %c0_207, %c0_208] : memref<8x8x128xf32, #tpu.memory_space<vmem>>, vector<1x8x128xf32>
    %406 = vector.shape_cast %405 : vector<1x8x128xf32> to vector<8x128xf32>
    %407 = vector.shape_cast %401 : vector<8x128xf32> to vector<1x8x128xf32>
    tpu.vector_store %arg8[%404, %c0_207, %c0_208], %407 {strides = array<i32>} : memref<8x8x128xf32, #tpu.memory_space<vmem>>, vector<1x8x128xf32>,
    %c8_i32_209 = arith.constant 8 : i32
    %408 = arith.muli %arg1, %c8_i32_209 : i32
    %409 = arith.addi %408, %c7_i32_186 : i32
    %c7_i32_210 = arith.constant 7 : i32
    %410 = arith.cmpi eq, %409, %c7_i32_210 : i32
    %411 = arith.extui %410 : i1 to i32
    %c0_i32_211 = arith.constant 0 : i32
    %412 = arith.cmpi ne, %411, %c0_i32_211 : i32
    scf.if %412 {
      %c0_213 = arith.constant 0 : index
      %c0_214 = arith.constant 0 : index
      %413 = vector.load %arg9[%c0_213, %c0_214] : memref<8x128xf32, #tpu.memory_space<vmem>>, vector<8x128xf32>
      tpu.vector_store %arg9[%c0_213, %c0_214], %399 {strides = array<i32>} : memref<8x128xf32, #tpu.memory_space<vmem>>, vector<8x128xf32>,
    } else {
    }
    %c8_i32_212 = arith.constant 8 : i32
    return
  }
  func.func @transform_0(%arg0: i32, %arg1: i32) -> (i32, i32, i32) {
    %c0_i32 = arith.constant 0 : i32
    %c0_i32_0 = arith.constant 0 : i32
    return %arg1, %arg0, %c0_i32 : i32, i32, i32
  }
  func.func @transform_1(%arg0: i32, %arg1: i32) -> (i32, i32) {
    %c0_i32 = arith.constant 0 : i32
    %c0_i32_0 = arith.constant 0 : i32
    %c0_i32_1 = arith.constant 0 : i32
    return %c0_i32, %c0_i32_0 : i32, i32
  }
  func.func @transform_2(%arg0: i32, %arg1: i32) -> (i32, i32) {
    %c0_i32 = arith.constant 0 : i32
    %c0_i32_0 = arith.constant 0 : i32
    %c0_i32_1 = arith.constant 0 : i32
    return %c0_i32, %c0_i32_0 : i32, i32
  }
  func.func @transform_3(%arg0: i32, %arg1: i32) -> (i32, i32) {
    %c0_i32 = arith.constant 0 : i32
    %c0_i32_0 = arith.constant 0 : i32
    %c0_i32_1 = arith.constant 0 : i32
    return %c0_i32, %c0_i32_0 : i32, i32
  }
  func.func @transform_4(%arg0: i32, %arg1: i32) -> (i32, i32) {
    %c0_i32 = arith.constant 0 : i32
    %c0_i32_0 = arith.constant 0 : i32
    return %arg0, %c0_i32 : i32, i32
  }
  func.func @transform_5(%arg0: i32, %arg1: i32) -> (i32, i32) {
    %c0_i32 = arith.constant 0 : i32
    %c0_i32_0 = arith.constant 0 : i32
    return %arg0, %c0_i32 : i32, i32
  }
  func.func @transform_6(%arg0: i32, %arg1: i32) -> (i32, i32, i32) {
    %c0_i32 = arith.constant 0 : i32
    %c0_i32_0 = arith.constant 0 : i32
    return %arg1, %arg0, %c0_i32 : i32, i32, i32
  }
  func.func @transform_7(%arg0: i32, %arg1: i32) -> (i32, i32) {
    %c0_i32 = arith.constant 0 : i32
    %c0_i32_0 = arith.constant 0 : i32
    return %arg0, %c0_i32 : i32, i32
  }
}

</mosaic_0001>

<bundles_post_ra>
// kernel: tpu_custom_call.1
= control target key start
LH: loop header
LB: loop body
LE: loop exit
PB: predicated region body
PF: predicated region fallthrough
CT: control target
= control target key end

     0   :  { %13 = vsyncpa [#allocation6], 0  ;;  %s2754_s0 = inlined_call_operand.hbm [shape: bf16[8,8,128], index: 0, kind: input, shape index: {}]   ;;  %s2755_s1 = inlined_call_operand.hbm [shape: bf16[128,512], index: 1, kind: input, shape index: {}]   ;;  %s2756_s2 = inlined_call_operand.hbm [shape: bf16[128,512], index: 2, kind: input, shape index: {}]   ;;  %s2757_s3 = inlined_call_operand.hbm [shape: f32[1,512], index: 3, kind: input, shape index: {}]   ;;  %s2758_s4 = inlined_call_operand.hbm [shape: f32[8,128], index: 4, kind: input, shape index: {}]   ;;  %s2759_s5 = inlined_call_operand.vmem [shape: f32[8,128], index: 5, kind: input, shape index: {}]   ;;  %s2760_s6 = inlined_call_operand.hbm [shape: f32[8,8,128], index: 6, kind: output, shape index: {0}]   ;;  %s2761_s7 = inlined_call_operand.hbm [shape: f32[8,128], index: 7, kind: output, shape index: {1}]  }
   0x1   :  { %14 = vsyncpa [#allocation9], 0 }
   0x2   :  { %15 = vsyncpa [#allocation12], 0 }
   0x3   :  { %16 = vsyncpa [#allocation7], 0 }
   0x4   :  { %17 = vsyncpa [#allocation16], 0  ;;  %s2167_s24 = smov [#allocation8]  }
   0x5   :  { %s35_s25 = sshll.u32 %s2167_s24, 4  ;;  %s36_s25 = int_to_ptr.vmem [resolvable:$true] %s35_s25 }
   0x6   :  { %s2025_s26 = scalar_lea.vmem %s36_s25, 4096  ;;  %p2030_p1 = scmp.lt.s32.totalorder %s36_s25, %s36_s25 }
   0x7   :  { %p2026_p0 = scmp.ne.s32.totalorder %s36_s25, %s2025_s26  ;;  %p2031_p2 = scmp.lt.s32.totalorder %s2025_s26, %s2025_s26 }
   0x9   :  { %p2032_p3 = por %p2031_p2, %p2030_p1 }
   0xb   :  { %p2033_p4 = pnand %p2032_p3, %p2026_p0 }
   0xd   :  { %2036 = shalt.err (!%p2033_p4)
}
   0xe   :  { %s2168_s27 = smov 256   ;;  %s2169_s28 = smov 16  }
   0xf   :  { %41 = dma.hbm_to_vmem [thread:$0]  %s2755_s1, 4096, %s36_s25, [#allocation9], %s2168_s27, %s2168_s27, %s2169_s28  }
  0x10   :  { %s2170_s8 = smov [#allocation11]   ;;  %s2171_s10 = smov [#allocation5]  }
  0x11   :  { %s60_s9 = sshll.u32 %s2170_s8, 4  ;;  %s23_s11 = sshll.u32 %s2171_s10, 4  ;;  %s61_s9 = int_to_ptr.vmem [resolvable:$true] %s60_s9  ;;  %s24_s11 = int_to_ptr.vmem [resolvable:$true] %s23_s11 }
  0x12   :  { %s2045_s12 = scalar_lea.vmem %s61_s9, 64  ;;  %p2050_p6 = scmp.lt.s32.totalorder %s61_s9, %s61_s9 }
  0x13   :  { %p2046_p5 = scmp.ne.s32.totalorder %s61_s9, %s2045_s12  ;;  %p2051_p7 = scmp.lt.s32.totalorder %s2045_s12, %s2045_s12 }
  0x15   :  { %p2052_p8 = por %p2051_p7, %p2050_p6 }
  0x17   :  { %p2053_p9 = pnand %p2052_p8, %p2046_p5 }
  0x19   :  { %2056 = shalt.err (!%p2053_p9)
}
  0x1a   :  { %63 = dma.hbm_to_vmem [thread:$0]  %s2757_s3, 64, %s61_s9, [#allocation12]  }
  0x1b   :  { %s2065_s15 = scalar_lea.vmem %s24_s11, 512  ;;  %p2070_p11 = scmp.lt.s32.totalorder %s24_s11, %s24_s11 }
  0x1c   :  { %p2066_p10 = scmp.ne.s32.totalorder %s24_s11, %s2065_s15  ;;  %p2071_p12 = scmp.lt.s32.totalorder %s2065_s15, %s2065_s15 }
  0x1e   :  { %p2072_p13 = por %p2071_p12, %p2070_p11 }
  0x20   :  { %p2073_p0 = pnand %p2072_p13, %p2066_p10 }
  0x22   :  { %2076 = shalt.err (!%p2073_p0)
}
  0x23   :  { %s2172_s1 = smov 64   ;;  %s2173_s16 = smov 4  }
  0x24   :  { %29 = dma.hbm_to_vmem [thread:$0]  %s2754_s0, 512, %s24_s11, [#allocation6], %s2172_s1, %s2172_s1, %s2173_s16  }
  0x25   :  { %s2174_s19 = smov [#allocation10]   ;;  %s2175_s21 = smov [#allocation13]  }
  0x26   :  { %s47_s20 = sshll.u32 %s2174_s19, 4  ;;  %s70_s22 = sshll.u32 %s2175_s21, 4  ;;  %s48_s20 = int_to_ptr.vmem [resolvable:$true] %s47_s20  ;;  %s71_s22 = int_to_ptr.vmem [resolvable:$true] %s70_s22 }
  0x27   :  { %s2085_s3 = scalar_lea.vmem %s48_s20, 4096  ;;  %p2090_p2 = scmp.lt.s32.totalorder %s48_s20, %s48_s20 }
  0x28   :  { %p2086_p1 = scmp.ne.s32.totalorder %s48_s20, %s2085_s3  ;;  %p2091_p3 = scmp.lt.s32.totalorder %s2085_s3, %s2085_s3 }
  0x2a   :  { %p2092_p4 = por %p2091_p3, %p2090_p2 }
  0x2c   :  { %p2093_p5 = pnand %p2092_p4, %p2086_p1 }
  0x2e   :  { %2096 = shalt.err (!%p2093_p5)
}
  0x2f   :  { %53 = dma.hbm_to_vmem [thread:$0]  %s2756_s2, 4096, %s48_s20, [#allocation9], %s2168_s27, %s2168_s27, %s2169_s28  }
  0x30   :  { %s2105_s0 = scalar_lea.vmem %s71_s22, 128  ;;  %p2110_p7 = scmp.lt.s32.totalorder %s71_s22, %s71_s22 }
  0x31   :  { %p2106_p6 = scmp.ne.s32.totalorder %s71_s22, %s2105_s0  ;;  %p2111_p8 = scmp.lt.s32.totalorder %s2105_s0, %s2105_s0 }
  0x33   :  { %p2112_p9 = por %p2111_p8, %p2110_p7 }
  0x35   :  { %p2113_p10 = pnand %p2112_p9, %p2106_p6 }
  0x37   :  { %2116 = shalt.err (!%p2113_p10)
}
  0x38   :  { %73 = dma.hbm_to_vmem [thread:$0]  %s2758_s4, 128, %s71_s22, [#allocation12]  }
  0x39   :  { %2157 = dma.done.wait [#allocation6], 512  }
  0x3a   :  { %2158 = vsyncadd [#allocation6], 4294966784 }
  0x3b   :  { %2159 = dma.done.wait [#allocation9], 8192  }
  0x3c   :  { %2160 = vsyncadd [#allocation9], 4294959104 }
  0x3d   :  { %2161 = dma.done.wait [#allocation12], 192  }
  0x3e   :  { %2162 = vsyncadd [#allocation12], 4294967104  ;;  %v2762_v0 = vmov 0   ;;  %v1805_v1 = vld [vmem:[#allocation8 + $0xe4] ss:$16 sps:$4 sm:$0xff]   ;;  %v1866_v44 = vld [vmem:[#allocation5 + $0x8] sm:$0xff]  }
  0x3f   :  { %378 = vmatprep.mubr.bf16.mxu0 %v2762_v0  ;;  %451 = vmatprep.mubr.bf16.mxu1 %v2762_v0  ;;  %v1807_v2 = vld [vmem:[#allocation8 + $0xec] ss:$16 sps:$4 sm:$0xff]   ;;  %v1809_v3 = vld [vmem:[#allocation8 + $0xe0] ss:$16 sps:$4 sm:$0xff]   ;;  %v1810_v4 = vld [vmem:[#allocation8 + $0xe8] ss:$16 sps:$4 sm:$0xff]  }
  0x40   :  { %346 = vmatprep.subr.bf16.mxu0 %v1805_v1  ;;  %419 = vmatprep.subr.bf16.mxu1 %v1807_v2  ;;  %v1811_v5 = vld [vmem:[#allocation8 + $0xc4] ss:$16 sps:$4 sm:$0xff]   ;;  %v1813_v6 = vld [vmem:[#allocation8 + $0xcc] ss:$16 sps:$4 sm:$0xff]   ;;  %v1815_v7 = vld [vmem:[#allocation8 + $0xc0] ss:$16 sps:$4 sm:$0xff]  }
  0x41   :  { %347 = vmatpush1.bf16.msra.mxu0 %v1809_v3  ;;  %420 = vmatpush1.bf16.msra.mxu1 %v1810_v4  ;;  %v1816_v8 = vld [vmem:[#allocation8 + $0xc8] ss:$16 sps:$4 sm:$0xff]   ;;  %v1817_v9 = vld [vmem:[#allocation8 + $0xa4] ss:$16 sps:$4 sm:$0xff]   ;;  %v1819_v10 = vld [vmem:[#allocation8 + $0xac] ss:$16 sps:$4 sm:$0xff]  }
  0x42   :  { %348 = vmatprep.subr.bf16.mxu0 %v1811_v5  ;;  %421 = vmatprep.subr.bf16.mxu1 %v1813_v6  ;;  %v1821_v11 = vld [vmem:[#allocation8 + $0xa0] ss:$16 sps:$4 sm:$0xff]   ;;  %v1822_v12 = vld [vmem:[#allocation8 + $0xa8] ss:$16 sps:$4 sm:$0xff]   ;;  %v1823_v13 = vld [vmem:[#allocation8 + $0x84] ss:$16 sps:$4 sm:$0xff]  }
  0x43   :  { %v1825_v14 = vld [vmem:[#allocation8 + $0x8c] ss:$16 sps:$4 sm:$0xff]   ;;  %v1827_v15 = vld [vmem:[#allocation8 + $0x80] ss:$16 sps:$4 sm:$0xff]   ;;  %v1828_v16 = vld [vmem:[#allocation8 + $0x88] ss:$16 sps:$4 sm:$0xff]  }
  0x44   :  { %v1829_v17 = vld [vmem:[#allocation8 + $0x64] ss:$16 sps:$4 sm:$0xff]   ;;  %v1831_v18 = vld [vmem:[#allocation8 + $0x6c] ss:$16 sps:$4 sm:$0xff]   ;;  %v1833_v19 = vld [vmem:[#allocation8 + $0x60] ss:$16 sps:$4 sm:$0xff]  }
  0x45   :  { %349 = vmatpush1.bf16.msra.mxu0 %v1815_v7  ;;  %422 = vmatpush1.bf16.msra.mxu1 %v1816_v8  ;;  %v1834_v20 = vld [vmem:[#allocation8 + $0x68] ss:$16 sps:$4 sm:$0xff]   ;;  %v1835_v21 = vld [vmem:[#allocation8 + $0x44] ss:$16 sps:$4 sm:$0xff]   ;;  %v1837_v22 = vld [vmem:[#allocation8 + $0x4c] ss:$16 sps:$4 sm:$0xff]   ;;  %v142_v8 = vlaneseq }
  0x46   :  { %350 = vmatprep.subr.bf16.mxu0 %v1817_v9  ;;  %423 = vmatprep.subr.bf16.mxu1 %v1819_v10  ;;  %v1839_v23 = vld [vmem:[#allocation8 + $0x40] ss:$16 sps:$4 sm:$0xff]   ;;  %v1840_v24 = vld [vmem:[#allocation8 + $0x48] ss:$16 sps:$4 sm:$0xff]   ;;  %v1841_v25 = vld [vmem:[#allocation8 + $0x24] ss:$16 sps:$4 sm:$0xff]  }
  0x47   :  { %v1843_v26 = vld [vmem:[#allocation8 + $0x2c] ss:$16 sps:$4 sm:$0xff]   ;;  %v1845_v27 = vld [vmem:[#allocation8 + $0x20] ss:$16 sps:$4 sm:$0xff]   ;;  %v1846_v28 = vld [vmem:[#allocation8 + $0x28] ss:$16 sps:$4 sm:$0xff]  }
  0x48   :  { %v1847_v29 = vld [vmem:[#allocation8 + $0x4] ss:$16 sps:$4 sm:$0xff]   ;;  %v1849_v30 = vld [vmem:[#allocation8 + $0xc] ss:$16 sps:$4 sm:$0xff]   ;;  %v1851_v31 = vld [vmem:[#allocation8] ss:$16 sps:$4 sm:$0xff]  }
  0x49   :  { %351 = vmatpush1.bf16.msra.mxu0 %v1821_v11  ;;  %424 = vmatpush1.bf16.msra.mxu1 %v1822_v12  ;;  %v1852_v32 = vld [vmem:[#allocation8 + $0x8] ss:$16 sps:$4 sm:$0xff]   ;;  %v2244_v33 = vld [vmem:[#allocation10 + $0xe4] ss:$16 sps:$4 sm:$0xff]   ;;  %v2246_v34 = vld [vmem:[#allocation10 + $0xec] ss:$16 sps:$4 sm:$0xff]  }
  0x4a   :  { %352 = vmatprep.subr.bf16.mxu0 %v1823_v13  ;;  %425 = vmatprep.subr.bf16.mxu1 %v1825_v14  ;;  %v1853_v35 = vld [vmem:[#allocation5] sm:$0xff]   ;;  %v2250_v37 = vld [vmem:[#allocation10 + $0xe8] ss:$16 sps:$4 sm:$0xff]   ;;  %v2256_v39 = vld [vmem:[#allocation10 + $0xcc] ss:$16 sps:$4 sm:$0xff]   ;;  %v143_v9 = vshrl.u32 %v142_v8, 7 }
  0x4b   :  { %v2248_v36 = vld [vmem:[#allocation10 + $0xe0] ss:$16 sps:$4 sm:$0xff]   ;;  %v2254_v38 = vld [vmem:[#allocation10 + $0xc4] ss:$16 sps:$4 sm:$0xff]   ;;  %v2262_v41 = vld [vmem:[#allocation10 + $0xc8] ss:$16 sps:$4 sm:$0xff]  }
  0x4c   :  { %v2258_v40 = vld [vmem:[#allocation10 + $0xc0] ss:$16 sps:$4 sm:$0xff]   ;;  %v2266_v42 = vld [vmem:[#allocation10 + $0xa4] ss:$16 sps:$4 sm:$0xff]   ;;  %v2268_v43 = vld [vmem:[#allocation10 + $0xac] ss:$16 sps:$4 sm:$0xff]  }
  0x4d   :  { %353 = vmatpush1.bf16.msra.mxu0 %v1827_v15  ;;  %426 = vmatpush1.bf16.msra.mxu1 %v1828_v16  ;;  %v2272_v45 = vld [vmem:[#allocation10 + $0xa0] ss:$16 sps:$4 sm:$0xff]   ;;  %v2274_v46 = vld [vmem:[#allocation10 + $0xa8] ss:$16 sps:$4 sm:$0xff]   ;;  %v2278_v47 = vld [vmem:[#allocation10 + $0x84] ss:$16 sps:$4 sm:$0xff]  }
  0x4e   :  { %354 = vmatprep.subr.bf16.mxu0 %v1829_v17  ;;  %427 = vmatprep.subr.bf16.mxu1 %v1831_v18  ;;  %v2282_v48 = vld [vmem:[#allocation10 + $0x8c] ss:$16 sps:$4 sm:$0xff]   ;;  %v2284_v49 = vld [vmem:[#allocation10 + $0x80] ss:$16 sps:$4 sm:$0xff]   ;;  %v2286_v50 = vld [vmem:[#allocation10 + $0x88] ss:$16 sps:$4 sm:$0xff]  }
  0x4f   :  { %v2290_v51 = vld [vmem:[#allocation10 + $0x64] ss:$16 sps:$4 sm:$0xff]   ;;  %v2294_v52 = vld [vmem:[#allocation10 + $0x6c] ss:$16 sps:$4 sm:$0xff]   ;;  %v2300_v54 = vld [vmem:[#allocation10 + $0x60] ss:$16 sps:$4 sm:$0xff]  }
  0x50   :  { %v1879_v53 = vld [vmem:[#allocation5 + $0x10] sm:$0xff]   ;;  %v2302_v55 = vld [vmem:[#allocation10 + $0x68] ss:$16 sps:$4 sm:$0xff]   ;;  %v2308_v57 = vld [vmem:[#allocation10 + $0x4c] ss:$16 sps:$4 sm:$0xff]   ;;  %v152_v10 = vsub.s32 2, %v143_v9 }
  0x51   :  { %355 = vmatpush1.bf16.msra.mxu0 %v1833_v19  ;;  %428 = vmatpush1.bf16.msra.mxu1 %v1834_v20  ;;  %v2306_v56 = vld [vmem:[#allocation10 + $0x44] ss:$16 sps:$4 sm:$0xff]   ;;  %v2312_v58 = vld [vmem:[#allocation10 + $0x40] ss:$16 sps:$4 sm:$0xff]   ;;  %v2314_v59 = vld [vmem:[#allocation10 + $0x48] ss:$16 sps:$4 sm:$0xff]  }
  0x52   :  { %356 = vmatprep.subr.bf16.mxu0 %v1835_v21  ;;  %429 = vmatprep.subr.bf16.mxu1 %v1837_v22  ;;  %v2318_v60 = vld [vmem:[#allocation10 + $0x24] ss:$16 sps:$4 sm:$0xff]   ;;  %v2320_v61 = vld [vmem:[#allocation10 + $0x2c] ss:$16 sps:$4 sm:$0xff]   ;;  %v2326_v63 = vld [vmem:[#allocation10 + $0x20] ss:$16 sps:$4 sm:$0xff]  }
  0x53   :  { %v1892_v62 = vld [vmem:[#allocation5 + $0x18] sm:$0xff]   ;;  %v2332_v2 = vld [vmem:[#allocation10 + $0x4] ss:$16 sps:$4 sm:$0xff]   ;;  %v2338_v4 = vld [vmem:[#allocation10] ss:$16 sps:$4 sm:$0xff]   ;;  %v144_v11 = vsub.s32 0, %v143_v9 }
  0x54   :  { %v2328_v1 = vld [vmem:[#allocation10 + $0x28] ss:$16 sps:$4 sm:$0xff]   ;;  %v2334_v3 = vld [vmem:[#allocation10 + $0xc] ss:$16 sps:$4 sm:$0xff]   ;;  %v156_v12 = vsub.s32 3, %v143_v9  ;;  %v148_v17 = vsub.s32 1, %v143_v9 }
  0x55   :  { %357 = vmatpush1.bf16.msra.mxu0 %v1839_v23  ;;  %430 = vmatpush1.bf16.msra.mxu1 %v1840_v24  ;;  %v2340_v5 = vld [vmem:[#allocation10 + $0x8] ss:$16 sps:$4 sm:$0xff]   ;;  %v140_v13 = vld [vmem:[#allocation11] sm:$0xf] }
  0x56   :  { %358 = vmatprep.subr.bf16.mxu0 %v1841_v25  ;;  %431 = vmatprep.subr.bf16.mxu1 %v1843_v26  ;;  %v96_v6 = vld [vmem:[#allocation13] sm:$0xff]  ;;  %v2388_v16 = vrot.slane %v140_v13, %v152_v10  ;;  %v145_v20 = vrot.slane %v140_v13, %v144_v11  ;;  %v2394_v21 = vrot.slane %v140_v13, %v156_v12 }
  0x57   :  { %v562_v7 = vpack.c.bf16 %v96_v6, %v96_v6  ;;  %v149_v24 = vrot.slane %v140_v13, %v148_v17 }
  0x59   :  { %359 = vmatpush1.bf16.msra.mxu0 %v1845_v27  ;;  %432 = vmatpush1.bf16.msra.mxu1 %v1846_v28 }
  0x5a   :  { %360 = vmatprep.subr.bf16.mxu0 %v1847_v29  ;;  %433 = vmatprep.subr.bf16.mxu1 %v1849_v30 }
  0x5d   :  { %361 = vmatpush1.bf16.msra.mxu0 %v1851_v31  ;;  %434 = vmatpush1.bf16.msra.mxu1 %v1852_v32 }
  0x5e   :  { %723 = vmatprep.subr.bf16.mxu0 %v2244_v33  ;;  %764 = vmatprep.subr.bf16.mxu1 %v2246_v34 }
  0x60   :  { %379 = vmatmul.mubr.bf16.vlgmr.msra.gmra.mxu0 %v1853_v35  ;;  %452 = vmatmul.mubr.bf16.vlgmr.msra.gmra.mxu1 %v1853_v35 }
  0x61   :  { %724 = vmatpush1.bf16.msra.mxu0 %v2248_v36  ;;  %765 = vmatpush1.bf16.msra.mxu1 %v2250_v37 }
  0x62   :  { %725 = vmatprep.subr.bf16.mxu0 %v2254_v38  ;;  %766 = vmatprep.subr.bf16.mxu1 %v2256_v39 }
  0x63   :  { %388 = vmatprep.mubr.bf16.mxu0 %v2762_v0  ;;  %461 = vmatprep.mubr.bf16.mxu1 %v2762_v0 }
  0x65   :  { %726 = vmatpush1.bf16.msra.mxu0 %v2258_v40  ;;  %767 = vmatpush1.bf16.msra.mxu1 %v2262_v41 }
  0x66   :  { %727 = vmatprep.subr.bf16.mxu0 %v2266_v42  ;;  %768 = vmatprep.subr.bf16.mxu1 %v2268_v43 }
  0x68   :  { %389 = vmatmul.mubr.bf16.gmra.mxu0 %v1866_v44  ;;  %462 = vmatmul.mubr.bf16.gmra.mxu1 %v1866_v44 }
  0x69   :  { %728 = vmatpush1.bf16.msra.mxu0 %v2272_v45  ;;  %769 = vmatpush1.bf16.msra.mxu1 %v2274_v46 }
  0x6a   :  { %729 = vmatprep.subr.bf16.mxu0 %v2278_v47  ;;  %770 = vmatprep.subr.bf16.mxu1 %v2282_v48 }
  0x6b   :  { %398 = vmatprep.mubr.bf16.mxu0 %v2762_v0  ;;  %471 = vmatprep.mubr.bf16.mxu1 %v2762_v0 }
  0x6d   :  { %730 = vmatpush1.bf16.msra.mxu0 %v2284_v49  ;;  %771 = vmatpush1.bf16.msra.mxu1 %v2286_v50 }
  0x6e   :  { %731 = vmatprep.subr.bf16.mxu0 %v2290_v51  ;;  %772 = vmatprep.subr.bf16.mxu1 %v2294_v52 }
  0x70   :  { %399 = vmatmul.mubr.bf16.gmra.mxu0 %v1879_v53  ;;  %472 = vmatmul.mubr.bf16.gmra.mxu1 %v1879_v53 }
  0x71   :  { %732 = vmatpush1.bf16.msra.mxu0 %v2300_v54  ;;  %773 = vmatpush1.bf16.msra.mxu1 %v2302_v55 }
  0x72   :  { %733 = vmatprep.subr.bf16.mxu0 %v2306_v56  ;;  %774 = vmatprep.subr.bf16.mxu1 %v2308_v57 }
  0x73   :  { %408 = vmatprep.mubr.bf16.mxu0 %v2762_v0  ;;  %481 = vmatprep.mubr.bf16.mxu1 %v2762_v0 }
  0x75   :  { %734 = vmatpush1.bf16.msra.mxu0 %v2312_v58  ;;  %775 = vmatpush1.bf16.msra.mxu1 %v2314_v59 }
  0x76   :  { %735 = vmatprep.subr.bf16.mxu0 %v2318_v60  ;;  %776 = vmatprep.subr.bf16.mxu1 %v2320_v61 }
  0x78   :  { %409 = vmatmul.mubr.bf16.gmra.mxu0 %v1892_v62  ;;  %482 = vmatmul.mubr.bf16.gmra.mxu1 %v1892_v62 }
  0x79   :  { %736 = vmatpush1.bf16.msra.mxu0 %v2326_v63  ;;  %777 = vmatpush1.bf16.msra.mxu1 %v2328_v1 }
  0x7a   :  { %737 = vmatprep.subr.bf16.mxu0 %v2332_v2  ;;  %778 = vmatprep.subr.bf16.mxu1 %v2334_v3 }
  0x7b   :  { %755 = vmatprep.mubr.bf16.mxu0 %v2762_v0  ;;  %796 = vmatprep.mubr.bf16.mxu1 %v2762_v0 }
  0x7d   :  { %738 = vmatpush1.bf16.msra.mxu0 %v2338_v4  ;;  %779 = vmatpush1.bf16.msra.mxu1 %v2340_v5 }
  0x7e   :  { %844 = vmatprep.subr.bf16.mxu0 %v2244_v33  ;;  %885 = vmatprep.subr.bf16.mxu1 %v2246_v34 }
  0x80   :  { %756 = vmatmul.mubr.bf16.vlgmr.msra.gmra.mxu0 %v562_v7  ;;  %797 = vmatmul.mubr.bf16.vlgmr.msra.gmra.mxu1 %v562_v7 }
  0x81   :  { %845 = vmatpush1.bf16.msra.mxu0 %v2248_v36  ;;  %886 = vmatpush1.bf16.msra.mxu1 %v2250_v37 }
  0x82   :  { %846 = vmatprep.subr.bf16.mxu0 %v2254_v38  ;;  %887 = vmatprep.subr.bf16.mxu1 %v2256_v39 }
  0x83   :  { %876 = vmatprep.mubr.bf16.mxu0 %v2762_v0  ;;  %917 = vmatprep.mubr.bf16.mxu1 %v2762_v0 }
  0x85   :  { %847 = vmatpush1.bf16.msra.mxu0 %v2258_v40  ;;  %888 = vmatpush1.bf16.msra.mxu1 %v2262_v41 }
  0x86   :  { %848 = vmatprep.subr.bf16.mxu0 %v2266_v42  ;;  %889 = vmatprep.subr.bf16.mxu1 %v2268_v43 }
  0x89   :  { %849 = vmatpush1.bf16.msra.mxu0 %v2272_v45  ;;  %890 = vmatpush1.bf16.msra.mxu1 %v2274_v46 }
  0x8a   :  { %850 = vmatprep.subr.bf16.mxu0 %v2278_v47  ;;  %891 = vmatprep.subr.bf16.mxu1 %v2282_v48 }
  0x8d   :  { %851 = vmatpush1.bf16.msra.mxu0 %v2284_v49  ;;  %892 = vmatpush1.bf16.msra.mxu1 %v2286_v50 }
  0x8e   :  { %852 = vmatprep.subr.bf16.mxu0 %v2290_v51  ;;  %893 = vmatprep.subr.bf16.mxu1 %v2294_v52 }
  0x91   :  { %853 = vmatpush1.bf16.msra.mxu0 %v2300_v54  ;;  %894 = vmatpush1.bf16.msra.mxu1 %v2302_v55 }
  0x92   :  { %854 = vmatprep.subr.bf16.mxu0 %v2306_v56  ;;  %895 = vmatprep.subr.bf16.mxu1 %v2308_v57 }
  0x95   :  { %855 = vmatpush1.bf16.msra.mxu0 %v2312_v58  ;;  %896 = vmatpush1.bf16.msra.mxu1 %v2314_v59 }
  0x96   :  { %856 = vmatprep.subr.bf16.mxu0 %v2318_v60  ;;  %897 = vmatprep.subr.bf16.mxu1 %v2320_v61 }
  0x99   :  { %857 = vmatpush1.bf16.msra.mxu0 %v2326_v63  ;;  %898 = vmatpush1.bf16.msra.mxu1 %v2328_v1 }
  0x9a   :  { %858 = vmatprep.subr.bf16.mxu0 %v2332_v2  ;;  %899 = vmatprep.subr.bf16.mxu1 %v2334_v3 }
  0x9d   :  { %859 = vmatpush1.bf16.msra.mxu0 %v2338_v4  ;;  %900 = vmatpush1.bf16.msra.mxu1 %v2340_v5 }
  0x9e   :  { %966 = vmatprep.subr.bf16.mxu0 %v2244_v33  ;;  %1007 = vmatprep.subr.bf16.mxu1 %v2246_v34 }
 0x120   :  { %v2384_v14 = vpop.f32.mrf.mxu0  ;;  %v2386_v15 = vpop.f32.mrf.mxu1 }
 0x122   :  { %v2390_v18 = vpop.f32.mrf.mxu0  ;;  %v2392_v19 = vpop.f32.mrf.mxu1 }
 0x124   :  { %v384_v22 = vpop.f32.mrf.mxu0  ;;  %v457_v23 = vpop.f32.mrf.mxu1 }
 0x125   :  { %v2396_v25 = vadd.f32 %v384_v22, %v145_v20  ;;  %v2399_v26 = vadd.f32 %v457_v23, %v2388_v16 }
 0x126   :  { %v386_v27 = vpop.f32.mrf.mxu0  ;;  %v459_v28 = vpop.f32.mrf.mxu1 }
 0x127   :  { %v2401_v29 = vadd.f32 %v386_v27, %v149_v24  ;;  %v2404_v30 = vadd.f32 %v459_v28, %v2394_v21 }
 0x128   :  { %v390_v31 = vpop.f32.mrf.mxu0  ;;  %v463_v32 = vpop.f32.mrf.mxu1 }
 0x129   :  { %v2406_v35 = vadd.f32 %v390_v31, %v145_v20  ;;  %v2409_v44 = vadd.f32 %v463_v32, %v2388_v16 }
 0x12a   :  { %v392_v53 = vpop.f32.mrf.mxu0  ;;  %v465_v62 = vpop.f32.mrf.mxu1 }
 0x12b   :  { %v2411_v6 = vadd.f32 %v392_v53, %v149_v24  ;;  %v2414_v7 = vadd.f32 %v465_v62, %v2394_v21 }
 0x12c   :  { %v394_v8 = vpop.f32.mrf.mxu0  ;;  %v467_v9 = vpop.f32.mrf.mxu1 }
 0x12d   :  { %v2416_v10 = vadd.f32 %v394_v8, %v145_v20  ;;  %v2419_v11 = vadd.f32 %v467_v9, %v2388_v16 }
 0x12e   :  { %v396_v12 = vpop.f32.mrf.mxu0  ;;  %v469_v13 = vpop.f32.mrf.mxu1 }
 0x12f   :  { %2764 = vst [vmem:[#allocation22_spill] sm:$0xff] %v2416_v10  ;;  %2765 = vst [vmem:[#allocation23_spill] sm:$0xff] %v2419_v11  ;;  %v2421_v17 = vadd.f32 %v396_v12, %v149_v24  ;;  %v2424_v22 = vadd.f32 %v469_v13, %v2394_v21  ;;  %v454_v10 = vadd.f32 %v2386_v15, %v2388_v16  ;;  %v98_v15 = vld [vmem:[%s2759_s5] sm:$0xff]  ;;  %s2177_s5 = smov [#allocation15]  }
 0x130   :  { %v400_v23 = vpop.f32.mrf.mxu0  ;;  %v473_v27 = vpop.f32.mrf.mxu1  ;;  %s1708_s27 = sshll.u32 %s2177_s5, 4  ;;  %s1709_s27 = int_to_ptr.vmem [resolvable:$true] %s1708_s27 }
 0x131   :  { %2766 = vst [vmem:[#allocation24_spill] sm:$0xff] %v2421_v17  ;;  %2767 = vst [vmem:[#allocation25_spill] sm:$0xff] %v2424_v22  ;;  %v2426_v28 = vadd.f32 %v400_v23, %v145_v20  ;;  %v2429_v31 = vadd.f32 %v473_v27, %v2388_v16  ;;  %s2117_s28 = scalar_lea.vmem %s1709_s27, 128  ;;  %p2122_p12 = scmp.lt.s32.totalorder %s1709_s27, %s1709_s27 }
 0x132   :  { %v402_v32 = vpop.f32.mrf.mxu0  ;;  %v475_v53 = vpop.f32.mrf.mxu1  ;;  %p2118_p11 = scmp.ne.s32.totalorder %s1709_s27, %s2117_s28  ;;  %p2123_p13 = scmp.lt.s32.totalorder %s2117_s28, %s2117_s28 }
 0x133   :  { %2768 = vst [vmem:[#allocation26_spill] sm:$0xff] %v2426_v28  ;;  %2769 = vst [vmem:[#allocation27_spill] sm:$0xff] %v2429_v31  ;;  %v2431_v62 = vadd.f32 %v402_v32, %v149_v24  ;;  %v2434_v8 = vadd.f32 %v475_v53, %v2394_v21 }
 0x134   :  { %v404_v9 = vpop.f32.mrf.mxu0  ;;  %v477_v12 = vpop.f32.mrf.mxu1  ;;  %p2124_p0 = por %p2123_p13, %p2122_p12 }
 0x135   :  { %2770 = vst [vmem:[#allocation28_spill] sm:$0xff] %v2431_v62  ;;  %2771 = vst [vmem:[#allocation29_spill] sm:$0xff] %v2434_v8  ;;  %v2436_v0 = vadd.f32 %v404_v9, %v145_v20  ;;  %v2439_v13 = vadd.f32 %v477_v12, %v2388_v16 }
 0x136   :  { %v406_v22 = vpop.f32.mrf.mxu0  ;;  %v479_v23 = vpop.f32.mrf.mxu1  ;;  %p2125_p1 = pnand %p2124_p0, %p2118_p11 }
 0x137   :  { %2772 = vst [vmem:[#allocation30_spill] sm:$0xff] %v2436_v0  ;;  %2773 = vst [vmem:[#allocation31_spill] sm:$0xff] %v2439_v13  ;;  %v2441_v28 = vadd.f32 %v406_v22, %v149_v24  ;;  %v2444_v27 = vadd.f32 %v479_v23, %v2394_v21 }
 0x138   :  { %v410_v31 = vpop.f32.mrf.mxu0  ;;  %v483_v32 = vpop.f32.mrf.mxu1 }
 0x139   :  { %2774 = vst [vmem:[#allocation32_spill] sm:$0xff] %v2441_v28  ;;  %2775 = vst [vmem:[#allocation33_spill] sm:$0xff] %v2444_v27  ;;  %v2446_v62 = vadd.f32 %v410_v31, %v145_v20  ;;  %v2449_v53 = vadd.f32 %v483_v32, %v2388_v16 }
 0x13a   :  { %v412_v8 = vpop.f32.mrf.mxu0  ;;  %v485_v9 = vpop.f32.mrf.mxu1 }
 0x13b   :  { %2776 = vst [vmem:[#allocation34_spill] sm:$0xff] %v2446_v62  ;;  %2777 = vst [vmem:[#allocation35_spill] sm:$0xff] %v2449_v53  ;;  %v2451_v0 = vadd.f32 %v412_v8, %v149_v24  ;;  %v2454_v12 = vadd.f32 %v485_v9, %v2394_v21  ;;  %v381_v62 = vadd.f32 %v2384_v14, %v145_v20 }
 0x13c   :  { %v414_v13 = vpop.f32.mrf.mxu0  ;;  %v487_v22 = vpop.f32.mrf.mxu1  ;;  %v383_v9 = vadd.f32 %v2390_v18, %v149_v24 }
 0x13d   :  { %2778 = vst [vmem:[#allocation36_spill] sm:$0xff] %v2451_v0  ;;  %2779 = vst [vmem:[#allocation37_spill] sm:$0xff] %v2454_v12  ;;  %v2456_v28 = vadd.f32 %v414_v13, %v145_v20  ;;  %v2459_v23 = vadd.f32 %v487_v22, %v2388_v16 }
 0x13e   :  { %v416_v27 = vpop.f32.mrf.mxu0  ;;  %v489_v31 = vpop.f32.mrf.mxu1 }
 0x13f   :  { %2780 = vst [vmem:[#allocation38_spill] sm:$0xff] %v2456_v28  ;;  %2781 = vst [vmem:[#allocation39_spill] sm:$0xff] %v2459_v23  ;;  %v2462_v32 = vadd.f32 %v416_v27, %v149_v24  ;;  %v2465_v53 = vadd.f32 %v489_v31, %v2394_v21 }
 0x140   :  { %v757_v8 = vpop.f32.mrf.mxu0  ;;  %v798_v0 = vpop.f32.mrf.mxu1 }
 0x141   :  { %2782 = vst [vmem:[#allocation40_spill] sm:$0xff] %v2465_v53  ;;  %v805_v12 = vadd.f32 %v757_v8, %v381_v62  ;;  %v807_v31 = vadd.f32 %v798_v0, %v454_v10  ;;  %v456_v53 = vadd.f32 %v2392_v19, %v2394_v21 }
 0x142   :  { %v759_v11 = vpop.f32.mrf.mxu0  ;;  %v800_v13 = vpop.f32.mrf.mxu1 }
 0x143   :  { %v809_v28 = vmul.f32 0.5, %v805_v12  ;;  %v806_v17 = vadd.f32 %v759_v11, %v383_v9  ;;  %v808_v18 = vadd.f32 %v800_v13, %v456_v53 }
 0x144   :  { %v761_v22 = vpop.f32.mrf.mxu0  ;;  %v802_v23 = vpop.f32.mrf.mxu1 }
 0x145   :  { %1905 = vtanh.f32 %v809_v28  ;;  %v813_v14 = vmul.f32 0.5, %v806_v17  ;;  %v818_v24 = vmul.f32 0.5, %v808_v18 }
 0x146   :  { %v762_v20 = vpop.f32.mrf.mxu0  ;;  %v803_v27 = vpop.f32.mrf.mxu1 }
 0x147   :  { %1907 = vtanh.f32 %v813_v14  ;;  %v2783_v14 = vmov 0  }
 0x148   :  { %1909 = vtanh.f32 %v807_v31 }
 0x149   :  { %1911 = vtanh.f32 %v818_v24 }
 0x152   :  { %v1906_v62 = vpop.eup %1905 }
 0x153   :  { %v811_v12 = vadd.f32 1.0, %v1906_v62 }
 0x154   :  { %v1908_v11 = vpop.eup %1907 }
 0x155   :  { %v812_v8 = vmul.f32 0.5, %v811_v12  ;;  %v815_v23 = vadd.f32 1.0, %v1908_v11  ;;  %v1910_v17 = vpop.eup %1909 }
 0x156   :  { %v1912_v19 = vpop.eup %1911 }
 0x157   :  { %v816_v16 = vmul.f32 0.5, %v815_v23  ;;  %v823_v10 = vmul.f32 %v1910_v17, %v812_v8  ;;  %v820_v21 = vadd.f32 1.0, %v1912_v19 }
 0x159   :  { %v822_v0 = vmul.f32 %v816_v16, %v98_v15  ;;  %v821_v53 = vmul.f32 0.5, %v820_v21 }
 0x15b   :  { %v2475_v28 = vadd.f32 %v823_v10, %v822_v0 }
 0x15d   :  { %1913 = vtanh.f32 %v2475_v28 }
 0x16a   :  { %v1914_v9 = vpop.eup %1913 }
 0x16b   :  { %v826_v13 = vmul.f32 %v1914_v9, %v821_v53 }
 0x16d   :  { %829 = vst [vmem:[#allocation14] sm:$0xff] %v826_v13  ;;  %v843_v22 = vpack.c.bf16 %v826_v13, %v826_v13 }
 0x16f   :  { %877 = vmatmul.mubr.bf16.vlgmr.msra.gmra.mxu0 %v843_v22  ;;  %918 = vmatmul.mubr.bf16.vlgmr.msra.gmra.mxu1 %v843_v22 }
 0x170   :  { %967 = vmatpush1.bf16.msra.mxu0 %v2248_v36  ;;  %1008 = vmatpush1.bf16.msra.mxu1 %v2250_v37 }
 0x171   :  { %968 = vmatprep.subr.bf16.mxu0 %v2254_v38  ;;  %1009 = vmatprep.subr.bf16.mxu1 %v2256_v39 }
 0x172   :  { %998 = vmatprep.mubr.bf16.mxu0 %v2783_v14  ;;  %1039 = vmatprep.mubr.bf16.mxu1 %v2783_v14 }
 0x174   :  { %969 = vmatpush1.bf16.msra.mxu0 %v2258_v40  ;;  %1010 = vmatpush1.bf16.msra.mxu1 %v2262_v41 }
 0x175   :  { %970 = vmatprep.subr.bf16.mxu0 %v2266_v42  ;;  %1011 = vmatprep.subr.bf16.mxu1 %v2268_v43 }
 0x178   :  { %971 = vmatpush1.bf16.msra.mxu0 %v2272_v45  ;;  %1012 = vmatpush1.bf16.msra.mxu1 %v2274_v46 }
 0x179   :  { %972 = vmatprep.subr.bf16.mxu0 %v2278_v47  ;;  %1013 = vmatprep.subr.bf16.mxu1 %v2282_v48 }
 0x17c   :  { %973 = vmatpush1.bf16.msra.mxu0 %v2284_v49  ;;  %1014 = vmatpush1.bf16.msra.mxu1 %v2286_v50 }
 0x17d   :  { %974 = vmatprep.subr.bf16.mxu0 %v2290_v51  ;;  %1015 = vmatprep.subr.bf16.mxu1 %v2294_v52 }
 0x180   :  { %975 = vmatpush1.bf16.msra.mxu0 %v2300_v54  ;;  %1016 = vmatpush1.bf16.msra.mxu1 %v2302_v55 }
 0x181   :  { %976 = vmatprep.subr.bf16.mxu0 %v2306_v56  ;;  %1017 = vmatprep.subr.bf16.mxu1 %v2308_v57 }
 0x184   :  { %977 = vmatpush1.bf16.msra.mxu0 %v2312_v58  ;;  %1018 = vmatpush1.bf16.msra.mxu1 %v2314_v59 }
 0x185   :  { %978 = vmatprep.subr.bf16.mxu0 %v2318_v60  ;;  %1019 = vmatprep.subr.bf16.mxu1 %v2320_v61 }
 0x188   :  { %979 = vmatpush1.bf16.msra.mxu0 %v2326_v63  ;;  %1020 = vmatpush1.bf16.msra.mxu1 %v2328_v1 }
 0x189   :  { %980 = vmatprep.subr.bf16.mxu0 %v2332_v2  ;;  %1021 = vmatprep.subr.bf16.mxu1 %v2334_v3 }
 0x18c   :  { %981 = vmatpush1.bf16.msra.mxu0 %v2338_v4  ;;  %1022 = vmatpush1.bf16.msra.mxu1 %v2340_v5 }
 0x18d   :  { %1088 = vmatprep.subr.bf16.mxu0 %v2244_v33  ;;  %1129 = vmatprep.subr.bf16.mxu1 %v2246_v34 }
 0x22f   :  { %v878_v20 = vpop.f32.mrf.mxu0  ;;  %v919_v27 = vpop.f32.mrf.mxu1 }
 0x230   :  { %v926_v31 = vadd.f32 %v878_v20, %v2396_v25  ;;  %v928_v23 = vadd.f32 %v919_v27, %v2399_v26 }
 0x231   :  { %v880_v18 = vpop.f32.mrf.mxu0  ;;  %v921_v24 = vpop.f32.mrf.mxu1 }
 0x232   :  { %v930_v62 = vmul.f32 0.5, %v926_v31  ;;  %v927_v12 = vadd.f32 %v880_v18, %v2401_v29  ;;  %v929_v0 = vadd.f32 %v921_v24, %v2404_v30 }
 0x233   :  { %v882_v11 = vpop.f32.mrf.mxu0  ;;  %v923_v8 = vpop.f32.mrf.mxu1 }
 0x234   :  { %1915 = vtanh.f32 %v930_v62  ;;  %v934_v15 = vmul.f32 0.5, %v927_v12  ;;  %v939_v10 = vmul.f32 0.5, %v929_v0 }
 0x235   :  { %v883_v16 = vpop.f32.mrf.mxu0  ;;  %v924_v17 = vpop.f32.mrf.mxu1 }
 0x236   :  { %1917 = vtanh.f32 %v934_v15 }
 0x237   :  { %1919 = vtanh.f32 %v928_v23 }
 0x238   :  { %1921 = vtanh.f32 %v939_v10 }
 0x241   :  { %v1916_v19 = vpop.eup %1915 }
 0x242   :  { %v932_v25 = vadd.f32 1.0, %v1916_v19 }
 0x243   :  { %v1918_v21 = vpop.eup %1917 }
 0x244   :  { %v933_v53 = vmul.f32 0.5, %v932_v25  ;;  %v936_v9 = vadd.f32 1.0, %v1918_v21  ;;  %v1920_v29 = vpop.eup %1919 }
 0x245   :  { %v1922_v27 = vpop.eup %1921 }
 0x246   :  { %v937_v13 = vmul.f32 0.5, %v936_v9  ;;  %v944_v22 = vmul.f32 %v1920_v29, %v933_v53  ;;  %v941_v31 = vadd.f32 1.0, %v1922_v27 }
 0x248   :  { %v943_v20 = vmul.f32 %v937_v13, %v2475_v28  ;;  %v942_v18 = vmul.f32 0.5, %v941_v31 }
 0x24a   :  { %v2517_v26 = vadd.f32 %v944_v22, %v943_v20 }
 0x24c   :  { %1923 = vtanh.f32 %v2517_v26 }
 0x259   :  { %v1924_v30 = vpop.eup %1923 }
 0x25a   :  { %v947_v24 = vmul.f32 %v1924_v30, %v942_v18 }
 0x25c   :  { %951 = vst [vmem:[#allocation14 + $0x8] sm:$0xff] %v947_v24  ;;  %v965_v62 = vpack.c.bf16 %v947_v24, %v947_v24 }
 0x25e   :  { %999 = vmatmul.mubr.bf16.vlgmr.msra.gmra.mxu0 %v965_v62  ;;  %1040 = vmatmul.mubr.bf16.vlgmr.msra.gmra.mxu1 %v965_v62 }
 0x25f   :  { %1089 = vmatpush1.bf16.msra.mxu0 %v2248_v36  ;;  %1130 = vmatpush1.bf16.msra.mxu1 %v2250_v37 }
 0x260   :  { %1090 = vmatprep.subr.bf16.mxu0 %v2254_v38  ;;  %1131 = vmatprep.subr.bf16.mxu1 %v2256_v39 }
 0x261   :  { %1120 = vmatprep.mubr.bf16.mxu0 %v2783_v14  ;;  %1161 = vmatprep.mubr.bf16.mxu1 %v2783_v14 }
 0x263   :  { %1091 = vmatpush1.bf16.msra.mxu0 %v2258_v40  ;;  %1132 = vmatpush1.bf16.msra.mxu1 %v2262_v41 }
 0x264   :  { %1092 = vmatprep.subr.bf16.mxu0 %v2266_v42  ;;  %1133 = vmatprep.subr.bf16.mxu1 %v2268_v43 }
 0x267   :  { %1093 = vmatpush1.bf16.msra.mxu0 %v2272_v45  ;;  %1134 = vmatpush1.bf16.msra.mxu1 %v2274_v46 }
 0x268   :  { %1094 = vmatprep.subr.bf16.mxu0 %v2278_v47  ;;  %1135 = vmatprep.subr.bf16.mxu1 %v2282_v48 }
 0x26b   :  { %1095 = vmatpush1.bf16.msra.mxu0 %v2284_v49  ;;  %1136 = vmatpush1.bf16.msra.mxu1 %v2286_v50 }
 0x26c   :  { %1096 = vmatprep.subr.bf16.mxu0 %v2290_v51  ;;  %1137 = vmatprep.subr.bf16.mxu1 %v2294_v52 }
 0x26f   :  { %1097 = vmatpush1.bf16.msra.mxu0 %v2300_v54  ;;  %1138 = vmatpush1.bf16.msra.mxu1 %v2302_v55 }
 0x270   :  { %1098 = vmatprep.subr.bf16.mxu0 %v2306_v56  ;;  %1139 = vmatprep.subr.bf16.mxu1 %v2308_v57 }
 0x273   :  { %1099 = vmatpush1.bf16.msra.mxu0 %v2312_v58  ;;  %1140 = vmatpush1.bf16.msra.mxu1 %v2314_v59 }
 0x274   :  { %1100 = vmatprep.subr.bf16.mxu0 %v2318_v60  ;;  %1141 = vmatprep.subr.bf16.mxu1 %v2320_v61 }
 0x277   :  { %1101 = vmatpush1.bf16.msra.mxu0 %v2326_v63  ;;  %1142 = vmatpush1.bf16.msra.mxu1 %v2328_v1 }
 0x278   :  { %1102 = vmatprep.subr.bf16.mxu0 %v2332_v2  ;;  %1143 = vmatprep.subr.bf16.mxu1 %v2334_v3 }
 0x27b   :  { %1103 = vmatpush1.bf16.msra.mxu0 %v2338_v4  ;;  %1144 = vmatpush1.bf16.msra.mxu1 %v2340_v5 }
 0x27c   :  { %1210 = vmatprep.subr.bf16.mxu0 %v2244_v33  ;;  %1251 = vmatprep.subr.bf16.mxu1 %v2246_v34 }
 0x31e   :  { %v1000_v28 = vpop.f32.mrf.mxu0  ;;  %v1041_v12 = vpop.f32.mrf.mxu1 }
 0x31f   :  { %v1048_v11 = vadd.f32 %v1000_v28, %v2406_v35  ;;  %v1050_v10 = vadd.f32 %v1041_v12, %v2409_v44 }
 0x320   :  { %v1002_v8 = vpop.f32.mrf.mxu0  ;;  %v1043_v23 = vpop.f32.mrf.mxu1 }
 0x321   :  { %v1052_v15 = vmul.f32 0.5, %v1048_v11  ;;  %v1049_v16 = vadd.f32 %v1002_v8, %v2411_v6  ;;  %v1051_v53 = vadd.f32 %v1043_v23, %v2414_v7  ;;  %v2784_v8 = vld [vmem:[#allocation22_spill] sm:$0xff] }
 0x322   :  { %v1004_v17 = vpop.f32.mrf.mxu0  ;;  %v1045_v0 = vpop.f32.mrf.mxu1 }
 0x323   :  { %1925 = vtanh.f32 %v1052_v15  ;;  %v1056_v19 = vmul.f32 0.5, %v1049_v16  ;;  %v1061_v9 = vmul.f32 0.5, %v1051_v53  ;;  %v2785_v0 = vld [vmem:[#allocation24_spill] sm:$0xff] }
 0x324   :  { %v1005_v25 = vpop.f32.mrf.mxu0  ;;  %v1046_v21 = vpop.f32.mrf.mxu1 }
 0x325   :  { %1927 = vtanh.f32 %v1056_v19  ;;  %v2786_v21 = vld [vmem:[#allocation23_spill] sm:$0xff] }
 0x326   :  { %1929 = vtanh.f32 %v1050_v10 }
 0x327   :  { %1931 = vtanh.f32 %v1061_v9 }
 0x330   :  { %v1926_v29 = vpop.eup %1925 }
 0x331   :  { %v1054_v35 = vadd.f32 1.0, %v1926_v29 }
 0x332   :  { %v1928_v13 = vpop.eup %1927 }
 0x333   :  { %v1055_v22 = vmul.f32 0.5, %v1054_v35  ;;  %v1058_v20 = vadd.f32 1.0, %v1928_v13  ;;  %v1930_v6 = vpop.eup %1929 }
 0x334   :  { %v1932_v30 = vpop.eup %1931 }
 0x335   :  { %v1059_v27 = vmul.f32 0.5, %v1058_v20  ;;  %v1066_v31 = vmul.f32 %v1930_v6, %v1055_v22  ;;  %v1063_v24 = vadd.f32 1.0, %v1932_v30 }
 0x337   :  { %v1065_v18 = vmul.f32 %v1059_v27, %v2517_v26  ;;  %v1064_v62 = vmul.f32 0.5, %v1063_v24 }
 0x339   :  { %v2559_v44 = vadd.f32 %v1066_v31, %v1065_v18 }
 0x33b   :  { %1933 = vtanh.f32 %v2559_v44 }
 0x348   :  { %v1934_v7 = vpop.eup %1933 }
 0x349   :  { %v1069_v28 = vmul.f32 %v1934_v7, %v1064_v62 }
 0x34b   :  { %1073 = vst [vmem:[#allocation14 + $0x10] sm:$0xff] %v1069_v28  ;;  %v1087_v12 = vpack.c.bf16 %v1069_v28, %v1069_v28 }
 0x34d   :  { %1121 = vmatmul.mubr.bf16.vlgmr.msra.gmra.mxu0 %v1087_v12  ;;  %1162 = vmatmul.mubr.bf16.vlgmr.msra.gmra.mxu1 %v1087_v12 }
 0x34e   :  { %1211 = vmatpush1.bf16.msra.mxu0 %v2248_v36  ;;  %1252 = vmatpush1.bf16.msra.mxu1 %v2250_v37 }
 0x34f   :  { %1212 = vmatprep.subr.bf16.mxu0 %v2254_v38  ;;  %1253 = vmatprep.subr.bf16.mxu1 %v2256_v39 }
 0x350   :  { %1242 = vmatprep.mubr.bf16.mxu0 %v2783_v14  ;;  %1283 = vmatprep.mubr.bf16.mxu1 %v2783_v14 }
 0x352   :  { %1213 = vmatpush1.bf16.msra.mxu0 %v2258_v40  ;;  %1254 = vmatpush1.bf16.msra.mxu1 %v2262_v41 }
 0x353   :  { %1214 = vmatprep.subr.bf16.mxu0 %v2266_v42  ;;  %1255 = vmatprep.subr.bf16.mxu1 %v2268_v43 }
 0x356   :  { %1215 = vmatpush1.bf16.msra.mxu0 %v2272_v45  ;;  %1256 = vmatpush1.bf16.msra.mxu1 %v2274_v46 }
 0x357   :  { %1216 = vmatprep.subr.bf16.mxu0 %v2278_v47  ;;  %1257 = vmatprep.subr.bf16.mxu1 %v2282_v48 }
 0x35a   :  { %1217 = vmatpush1.bf16.msra.mxu0 %v2284_v49  ;;  %1258 = vmatpush1.bf16.msra.mxu1 %v2286_v50 }
 0x35b   :  { %1218 = vmatprep.subr.bf16.mxu0 %v2290_v51  ;;  %1259 = vmatprep.subr.bf16.mxu1 %v2294_v52 }
 0x35e   :  { %1219 = vmatpush1.bf16.msra.mxu0 %v2300_v54  ;;  %1260 = vmatpush1.bf16.msra.mxu1 %v2302_v55 }
 0x35f   :  { %1220 = vmatprep.subr.bf16.mxu0 %v2306_v56  ;;  %1261 = vmatprep.subr.bf16.mxu1 %v2308_v57 }
 0x362   :  { %1221 = vmatpush1.bf16.msra.mxu0 %v2312_v58  ;;  %1262 = vmatpush1.bf16.msra.mxu1 %v2314_v59 }
 0x363   :  { %1222 = vmatprep.subr.bf16.mxu0 %v2318_v60  ;;  %1263 = vmatprep.subr.bf16.mxu1 %v2320_v61 }
 0x366   :  { %1223 = vmatpush1.bf16.msra.mxu0 %v2326_v63  ;;  %1264 = vmatpush1.bf16.msra.mxu1 %v2328_v1 }
 0x367   :  { %1224 = vmatprep.subr.bf16.mxu0 %v2332_v2  ;;  %1265 = vmatprep.subr.bf16.mxu1 %v2334_v3 }
 0x36a   :  { %1225 = vmatpush1.bf16.msra.mxu0 %v2338_v4  ;;  %1266 = vmatpush1.bf16.msra.mxu1 %v2340_v5 }
 0x36b   :  { %1332 = vmatprep.subr.bf16.mxu0 %v2244_v33  ;;  %1373 = vmatprep.subr.bf16.mxu1 %v2246_v34  ;;  %v2787_v33 = vld [vmem:[#allocation25_spill] sm:$0xff] }
 0x40d   :  { %v1122_v26 = vpop.f32.mrf.mxu0  ;;  %v1163_v11 = vpop.f32.mrf.mxu1 }
 0x40e   :  { %v1170_v23 = vadd.f32 %v1122_v26, %v2784_v8  ;;  %v1172_v53 = vadd.f32 %v1163_v11, %v2786_v21 }
 0x40f   :  { %v1124_v15 = vpop.f32.mrf.mxu0  ;;  %v1165_v16 = vpop.f32.mrf.mxu1 }
 0x410   :  { %v1174_v17 = vmul.f32 0.5, %v1170_v23  ;;  %v1171_v10 = vadd.f32 %v1124_v15, %v2785_v0  ;;  %v1173_v34 = vadd.f32 %v1165_v16, %v2787_v33 }
 0x411   :  { %v1126_v19 = vpop.f32.mrf.mxu0  ;;  %v1167_v25 = vpop.f32.mrf.mxu1 }
 0x412   :  { %1935 = vtanh.f32 %v1174_v17  ;;  %v1178_v9 = vmul.f32 0.5, %v1171_v10  ;;  %v1183_v13 = vmul.f32 0.5, %v1173_v34  ;;  %v2791_v17 = vld [vmem:[#allocation29_spill] sm:$0xff] }
 0x413   :  { %v1127_v29 = vpop.f32.mrf.mxu0  ;;  %v1168_v35 = vpop.f32.mrf.mxu1 }
 0x414   :  { %1937 = vtanh.f32 %v1178_v9 }
 0x415   :  { %1939 = vtanh.f32 %v1172_v53 }
 0x416   :  { %1941 = vtanh.f32 %v1183_v13 }
 0x41f   :  { %v1936_v22 = vpop.eup %1935 }
 0x420   :  { %v1176_v20 = vadd.f32 1.0, %v1936_v22 }
 0x421   :  { %v1938_v6 = vpop.eup %1937 }
 0x422   :  { %v1177_v27 = vmul.f32 0.5, %v1176_v20  ;;  %v1180_v31 = vadd.f32 1.0, %v1938_v6  ;;  %v1940_v18 = vpop.eup %1939 }
 0x423   :  { %v1942_v28 = vpop.eup %1941 }
 0x424   :  { %v1181_v30 = vmul.f32 0.5, %v1180_v31  ;;  %v1188_v24 = vmul.f32 %v1940_v18, %v1177_v27  ;;  %v1185_v12 = vadd.f32 1.0, %v1942_v28  ;;  %v2664_v28 = vld [vmem:[#allocation10 + $0xc0] ss:$16 sps:$4 sm:$0xff]  }
 0x426   :  { %v1187_v62 = vmul.f32 %v1181_v30, %v2559_v44  ;;  %v1186_v26 = vmul.f32 0.5, %v1185_v12  ;;  %v2650_v30 = vld [vmem:[#allocation10 + $0xe0] ss:$16 sps:$4 sm:$0xff]   ;;  %v2667_v12 = vld [vmem:[#allocation10 + $0xc8] ss:$16 sps:$4 sm:$0xff]  }
 0x428   :  { %v2601_v7 = vadd.f32 %v1188_v24, %v1187_v62  ;;  %v2653_v24 = vld [vmem:[#allocation10 + $0xe8] ss:$16 sps:$4 sm:$0xff]   ;;  %v2656_v62 = vld [vmem:[#allocation10 + $0xc4] ss:$16 sps:$4 sm:$0xff]  }
 0x42a   :  { %1943 = vtanh.f32 %v2601_v7 }
 0x437   :  { %v1944_v11 = vpop.eup %1943 }
 0x438   :  { %v1191_v8 = vmul.f32 %v1944_v11, %v1186_v26  ;;  %v2670_v26 = vld [vmem:[#allocation10 + $0xa4] ss:$16 sps:$4 sm:$0xff]   ;;  %v2673_v11 = vld [vmem:[#allocation10 + $0xac] ss:$16 sps:$4 sm:$0xff]  }
 0x43a   :  { %1195 = vst [vmem:[#allocation14 + $0x18] sm:$0xff] %v1191_v8  ;;  %v1209_v23 = vpack.c.bf16 %v1191_v8, %v1191_v8  ;;  %v2676_v8 = vld [vmem:[#allocation10 + $0xa0] ss:$16 sps:$4 sm:$0xff]  }
 0x43c   :  { %1243 = vmatmul.mubr.bf16.vlgmr.msra.gmra.mxu0 %v1209_v23  ;;  %1284 = vmatmul.mubr.bf16.vlgmr.msra.gmra.mxu1 %v1209_v23  ;;  %v2679_v23 = vld [vmem:[#allocation10 + $0xa8] ss:$16 sps:$4 sm:$0xff]  }
 0x43d   :  { %1333 = vmatpush1.bf16.msra.mxu0 %v2248_v36  ;;  %1374 = vmatpush1.bf16.msra.mxu1 %v2250_v37  ;;  %v2636_v36 = vld [vmem:[#allocation10 + $0xe4] ss:$16 sps:$4 sm:$0xff]   ;;  %v2639_v37 = vld [vmem:[#allocation10 + $0xec] ss:$16 sps:$4 sm:$0xff]  }
 0x43e   :  { %1334 = vmatprep.subr.bf16.mxu0 %v2254_v38  ;;  %1375 = vmatprep.subr.bf16.mxu1 %v2256_v39 }
 0x43f   :  { %1364 = vmatprep.mubr.bf16.mxu0 %v2783_v14  ;;  %1405 = vmatprep.mubr.bf16.mxu1 %v2783_v14 }
 0x441   :  { %1335 = vmatpush1.bf16.msra.mxu0 %v2258_v40  ;;  %1376 = vmatpush1.bf16.msra.mxu1 %v2262_v41  ;;  %v2788_v40 = vld [vmem:[#allocation26_spill] sm:$0xff] }
 0x442   :  { %1336 = vmatprep.subr.bf16.mxu0 %v2266_v42  ;;  %1377 = vmatprep.subr.bf16.mxu1 %v2268_v43 }
 0x445   :  { %1337 = vmatpush1.bf16.msra.mxu0 %v2272_v45  ;;  %1378 = vmatpush1.bf16.msra.mxu1 %v2274_v46  ;;  %v2789_v46 = vld [vmem:[#allocation28_spill] sm:$0xff] }
 0x446   :  { %1338 = vmatprep.subr.bf16.mxu0 %v2278_v47  ;;  %1379 = vmatprep.subr.bf16.mxu1 %v2282_v48 }
 0x449   :  { %1339 = vmatpush1.bf16.msra.mxu0 %v2284_v49  ;;  %1380 = vmatpush1.bf16.msra.mxu1 %v2286_v50  ;;  %v2790_v50 = vld [vmem:[#allocation27_spill] sm:$0xff] }
 0x44a   :  { %1340 = vmatprep.subr.bf16.mxu0 %v2290_v51  ;;  %1381 = vmatprep.subr.bf16.mxu1 %v2294_v52 }
 0x44d   :  { %1341 = vmatpush1.bf16.msra.mxu0 %v2300_v54  ;;  %1382 = vmatpush1.bf16.msra.mxu1 %v2302_v55 }
 0x44e   :  { %1342 = vmatprep.subr.bf16.mxu0 %v2306_v56  ;;  %1383 = vmatprep.subr.bf16.mxu1 %v2308_v57 }
 0x451   :  { %1343 = vmatpush1.bf16.msra.mxu0 %v2312_v58  ;;  %1384 = vmatpush1.bf16.msra.mxu1 %v2314_v59 }
 0x452   :  { %1344 = vmatprep.subr.bf16.mxu0 %v2318_v60  ;;  %1385 = vmatprep.subr.bf16.mxu1 %v2320_v61 }
 0x455   :  { %1345 = vmatpush1.bf16.msra.mxu0 %v2326_v63  ;;  %1386 = vmatpush1.bf16.msra.mxu1 %v2328_v1 }
 0x456   :  { %1346 = vmatprep.subr.bf16.mxu0 %v2332_v2  ;;  %1387 = vmatprep.subr.bf16.mxu1 %v2334_v3 }
 0x459   :  { %1347 = vmatpush1.bf16.msra.mxu0 %v2338_v4  ;;  %1388 = vmatpush1.bf16.msra.mxu1 %v2340_v5 }
 0x45a   :  { %1454 = vmatprep.subr.bf16.mxu0 %v2636_v36  ;;  %1495 = vmatprep.subr.bf16.mxu1 %v2639_v37 }
 0x4fc   :  { %v1244_v38 = vpop.f32.mrf.mxu0  ;;  %v1285_v39 = vpop.f32.mrf.mxu1 }
 0x4fd   :  { %v1292_v41 = vadd.f32 %v1244_v38, %v2788_v40  ;;  %v1294_v51 = vadd.f32 %v1285_v39, %v2790_v50  ;;  %v2682_v38 = vld [vmem:[#allocation10 + $0x84] ss:$16 sps:$4 sm:$0xff]   ;;  %v2685_v39 = vld [vmem:[#allocation10 + $0x8c] ss:$16 sps:$4 sm:$0xff]   ;;  %v2688_v40 = vld [vmem:[#allocation10 + $0x80] ss:$16 sps:$4 sm:$0xff]  }
 0x4fe   :  { %v1246_v42 = vpop.f32.mrf.mxu0  ;;  %v1287_v43 = vpop.f32.mrf.mxu1 }
 0x4ff   :  { %v1296_v45 = vmul.f32 0.5, %v1292_v41  ;;  %v1293_v47 = vadd.f32 %v1246_v42, %v2789_v46  ;;  %v1295_v0 = vadd.f32 %v1287_v43, %v2791_v17  ;;  %v2691_v41 = vld [vmem:[#allocation10 + $0x88] ss:$16 sps:$4 sm:$0xff]   ;;  %v2694_v42 = vld [vmem:[#allocation10 + $0x64] ss:$16 sps:$4 sm:$0xff]  }
 0x500   :  { %v1248_v48 = vpop.f32.mrf.mxu0  ;;  %v1289_v49 = vpop.f32.mrf.mxu1 }
 0x501   :  { %1945 = vtanh.f32 %v1296_v45  ;;  %v1300_v44 = vmul.f32 0.5, %v1293_v47  ;;  %v1305_v10 = vmul.f32 0.5, %v1295_v0 }
 0x502   :  { %v1249_v15 = vpop.f32.mrf.mxu0  ;;  %v1290_v16 = vpop.f32.mrf.mxu1 }
 0x503   :  { %1947 = vtanh.f32 %v1300_v44 }
 0x504   :  { %1949 = vtanh.f32 %v1294_v51 }
 0x505   :  { %1951 = vtanh.f32 %v1305_v10 }
 0x50e   :  { %v1946_v19 = vpop.eup %1945 }
 0x50f   :  { %v1298_v25 = vadd.f32 1.0, %v1946_v19 }
 0x510   :  { %v1948_v21 = vpop.eup %1947 }
 0x511   :  { %v1299_v53 = vmul.f32 0.5, %v1298_v25  ;;  %v1302_v9 = vadd.f32 1.0, %v1948_v21  ;;  %v1950_v29 = vpop.eup %1949 }
 0x512   :  { %v1952_v22 = vpop.eup %1951 }
 0x513   :  { %v1303_v35 = vmul.f32 0.5, %v1302_v9  ;;  %v1310_v33 = vmul.f32 %v1950_v29, %v1299_v53  ;;  %v1307_v20 = vadd.f32 1.0, %v1952_v22  ;;  %v2003_v9 = vld [vmem:[#allocation10 + $0x60] ss:$16 sps:$4 sm:$0xff]   ;;  %v2004_v29 = vld [vmem:[#allocation10 + $0x68] ss:$16 sps:$4 sm:$0xff]  }
 0x514   :  { %v2009_v22 = vld [vmem:[#allocation10 + $0x24] ss:$16 sps:$4 sm:$0xff]  }
 0x515   :  { %v1309_v34 = vmul.f32 %v1303_v35, %v2601_v7  ;;  %v1308_v6 = vmul.f32 0.5, %v1307_v20  ;;  %v2659_v7 = vld [vmem:[#allocation10 + $0xcc] ss:$16 sps:$4 sm:$0xff]   ;;  %v2005_v35 = vld [vmem:[#allocation10 + $0x44] ss:$16 sps:$4 sm:$0xff]  }
 0x516   :  { %v2010_v20 = vld [vmem:[#allocation10 + $0x2c] ss:$16 sps:$4 sm:$0xff]  }
 0x517   :  { %v2647_v13 = vadd.f32 %v1310_v33, %v1309_v34  ;;  %v2006_v33 = vld [vmem:[#allocation10 + $0x4c] ss:$16 sps:$4 sm:$0xff]   ;;  %v2007_v34 = vld [vmem:[#allocation10 + $0x40] ss:$16 sps:$4 sm:$0xff]  }
 0x519   :  { %1953 = vtanh.f32 %v2647_v13 }
 0x526   :  { %v1954_v27 = vpop.eup %1953 }
 0x527   :  { %v1313_v31 = vmul.f32 %v1954_v27, %v1308_v6  ;;  %v2011_v6 = vld [vmem:[#allocation10 + $0x20] ss:$16 sps:$4 sm:$0xff]   ;;  %v2012_v27 = vld [vmem:[#allocation10 + $0x28] ss:$16 sps:$4 sm:$0xff]  }
 0x529   :  { %1317 = vst [vmem:[#allocation14 + $0x20] sm:$0xff] %v1313_v31  ;;  %v1331_v18 = vpack.c.bf16 %v1313_v31, %v1313_v31  ;;  %v2013_v31 = vld [vmem:[#allocation10 + $0x4] ss:$16 sps:$4 sm:$0xff]  }
 0x52b   :  { %1365 = vmatmul.mubr.bf16.vlgmr.msra.gmra.mxu0 %v1331_v18  ;;  %1406 = vmatmul.mubr.bf16.vlgmr.msra.gmra.mxu1 %v1331_v18  ;;  %v2014_v18 = vld [vmem:[#allocation10 + $0xc] ss:$16 sps:$4 sm:$0xff]  }
 0x52c   :  { %1455 = vmatpush1.bf16.msra.mxu0 %v2650_v30  ;;  %1496 = vmatpush1.bf16.msra.mxu1 %v2653_v24 }
 0x52d   :  { %1456 = vmatprep.subr.bf16.mxu0 %v2656_v62  ;;  %1497 = vmatprep.subr.bf16.mxu1 %v2659_v7 }
 0x52e   :  { %1486 = vmatprep.mubr.bf16.mxu0 %v2783_v14  ;;  %1527 = vmatprep.mubr.bf16.mxu1 %v2783_v14 }
 0x530   :  { %1457 = vmatpush1.bf16.msra.mxu0 %v2664_v28  ;;  %1498 = vmatpush1.bf16.msra.mxu1 %v2667_v12 }
 0x531   :  { %1458 = vmatprep.subr.bf16.mxu0 %v2670_v26  ;;  %1499 = vmatprep.subr.bf16.mxu1 %v2673_v11 }
 0x534   :  { %1459 = vmatpush1.bf16.msra.mxu0 %v2676_v8  ;;  %1500 = vmatpush1.bf16.msra.mxu1 %v2679_v23 }
 0x535   :  { %1460 = vmatprep.subr.bf16.mxu0 %v2682_v38  ;;  %1501 = vmatprep.subr.bf16.mxu1 %v2685_v39 }
 0x538   :  { %1461 = vmatpush1.bf16.msra.mxu0 %v2688_v40  ;;  %1502 = vmatpush1.bf16.msra.mxu1 %v2691_v41 }
 0x539   :  { %1462 = vmatprep.subr.bf16.mxu0 %v2694_v42  ;;  %1503 = vmatprep.subr.bf16.mxu1 %v2294_v52 }
 0x53c   :  { %1463 = vmatpush1.bf16.msra.mxu0 %v2300_v54  ;;  %1504 = vmatpush1.bf16.msra.mxu1 %v2302_v55  ;;  %v2792_v55 = vld [vmem:[#allocation30_spill] sm:$0xff] }
 0x53d   :  { %1464 = vmatprep.subr.bf16.mxu0 %v2306_v56  ;;  %1505 = vmatprep.subr.bf16.mxu1 %v2308_v57 }
 0x540   :  { %1465 = vmatpush1.bf16.msra.mxu0 %v2312_v58  ;;  %1506 = vmatpush1.bf16.msra.mxu1 %v2314_v59 }
 0x541   :  { %1466 = vmatprep.subr.bf16.mxu0 %v2318_v60  ;;  %1507 = vmatprep.subr.bf16.mxu1 %v2320_v61  ;;  %v2793_v60 = vld [vmem:[#allocation32_spill] sm:$0xff] }
 0x544   :  { %1467 = vmatpush1.bf16.msra.mxu0 %v2326_v63  ;;  %1508 = vmatpush1.bf16.msra.mxu1 %v2328_v1 }
 0x545   :  { %1468 = vmatprep.subr.bf16.mxu0 %v2332_v2  ;;  %1509 = vmatprep.subr.bf16.mxu1 %v2334_v3  ;;  %v2794_v2 = vld [vmem:[#allocation31_spill] sm:$0xff] }
 0x548   :  { %1469 = vmatpush1.bf16.msra.mxu0 %v2338_v4  ;;  %1510 = vmatpush1.bf16.msra.mxu1 %v2340_v5 }
 0x549   :  { %1576 = vmatprep.subr.bf16.mxu0 %v2636_v36  ;;  %1617 = vmatprep.subr.bf16.mxu1 %v2639_v37  ;;  %v2795_v36 = vld [vmem:[#allocation33_spill] sm:$0xff] }
 0x5eb   :  { %v1366_v52 = vpop.f32.mrf.mxu0  ;;  %v1407_v54 = vpop.f32.mrf.mxu1 }
 0x5ec   :  { %v1414_v56 = vadd.f32 %v1366_v52, %v2792_v55  ;;  %v1416_v3 = vadd.f32 %v1407_v54, %v2794_v2 }
 0x5ed   :  { %v1368_v57 = vpop.f32.mrf.mxu0  ;;  %v1409_v58 = vpop.f32.mrf.mxu1 }
 0x5ee   :  { %v1418_v59 = vmul.f32 0.5, %v1414_v56  ;;  %v1415_v61 = vadd.f32 %v1368_v57, %v2793_v60  ;;  %v1417_v37 = vadd.f32 %v1409_v58, %v2795_v36  ;;  %v2799_v56 = vld [vmem:[#allocation37_spill] sm:$0xff] }
 0x5ef   :  { %v1370_v63 = vpop.f32.mrf.mxu0  ;;  %v1411_v1 = vpop.f32.mrf.mxu1 }
 0x5f0   :  { %1955 = vtanh.f32 %v1418_v59  ;;  %v1422_v4 = vmul.f32 0.5, %v1415_v61  ;;  %v1427_v45 = vmul.f32 0.5, %v1417_v37 }
 0x5f1   :  { %v1371_v5 = vpop.f32.mrf.mxu0  ;;  %v1412_v43 = vpop.f32.mrf.mxu1 }
 0x5f2   :  { %1957 = vtanh.f32 %v1422_v4 }
 0x5f3   :  { %1959 = vtanh.f32 %v1416_v3 }
 0x5f4   :  { %1961 = vtanh.f32 %v1427_v45 }
 0x5fd   :  { %v1956_v46 = vpop.eup %1955 }
 0x5fe   :  { %v1420_v47 = vadd.f32 1.0, %v1956_v46 }
 0x5ff   :  { %v1958_v48 = vpop.eup %1957 }
 0x600   :  { %v1421_v49 = vmul.f32 0.5, %v1420_v47  ;;  %v1424_v50 = vadd.f32 1.0, %v1958_v48  ;;  %v1960_v51 = vpop.eup %1959 }
 0x601   :  { %v1962_v0 = vpop.eup %1961 }
 0x602   :  { %v1425_v44 = vmul.f32 0.5, %v1424_v50  ;;  %v1432_v15 = vmul.f32 %v1960_v51, %v1421_v49  ;;  %v1429_v10 = vadd.f32 1.0, %v1962_v0  ;;  %v2800_v51 = vld [vmem:[#allocation38_spill] sm:$0xff] }
 0x604   :  { %v1431_v16 = vmul.f32 %v1425_v44, %v2647_v13  ;;  %v1430_v19 = vmul.f32 0.5, %v1429_v10  ;;  %v2008_v13 = vld [vmem:[#allocation10 + $0x48] ss:$16 sps:$4 sm:$0xff]  }
 0x606   :  { %v2719_v17 = vadd.f32 %v1432_v15, %v1431_v16 }
 0x608   :  { %1963 = vtanh.f32 %v2719_v17 }
 0x615   :  { %v1964_v25 = vpop.eup %1963 }
 0x616   :  { %v1435_v21 = vmul.f32 %v1964_v25, %v1430_v19  ;;  %v2801_v25 = vld [vmem:[#allocation39_spill] sm:$0xff] }
 0x618   :  { %1439 = vst [vmem:[#allocation14 + $0x28] sm:$0xff] %v1435_v21  ;;  %v1453_v53 = vpack.c.bf16 %v1435_v21, %v1435_v21 }
 0x61a   :  { %1487 = vmatmul.mubr.bf16.vlgmr.msra.gmra.mxu0 %v1453_v53  ;;  %1528 = vmatmul.mubr.bf16.vlgmr.msra.gmra.mxu1 %v1453_v53 }
 0x61b   :  { %1577 = vmatpush1.bf16.msra.mxu0 %v2650_v30  ;;  %1618 = vmatpush1.bf16.msra.mxu1 %v2653_v24  ;;  %v2015_v30 = vld [vmem:[#allocation10] ss:$16 sps:$4 sm:$0xff]   ;;  %v2016_v24 = vld [vmem:[#allocation10 + $0x8] ss:$16 sps:$4 sm:$0xff]  }
 0x61c   :  { %1578 = vmatprep.subr.bf16.mxu0 %v2656_v62  ;;  %1619 = vmatprep.subr.bf16.mxu1 %v2659_v7 }
 0x61d   :  { %1608 = vmatprep.mubr.bf16.mxu0 %v2783_v14  ;;  %1649 = vmatprep.mubr.bf16.mxu1 %v2783_v14  ;;  %v2002_v14 = vld [vmem:[#allocation10 + $0x6c] ss:$16 sps:$4 sm:$0xff]  }
 0x61f   :  { %1579 = vmatpush1.bf16.msra.mxu0 %v2664_v28  ;;  %1620 = vmatpush1.bf16.msra.mxu1 %v2667_v12  ;;  %v2796_v28 = vld [vmem:[#allocation34_spill] sm:$0xff] }
 0x620   :  { %1580 = vmatprep.subr.bf16.mxu0 %v2670_v26  ;;  %1621 = vmatprep.subr.bf16.mxu1 %v2673_v11 }
 0x623   :  { %1581 = vmatpush1.bf16.msra.mxu0 %v2676_v8  ;;  %1622 = vmatpush1.bf16.msra.mxu1 %v2679_v23  ;;  %v2797_v23 = vld [vmem:[#allocation36_spill] sm:$0xff] }
 0x624   :  { %1582 = vmatprep.subr.bf16.mxu0 %v2682_v38  ;;  %1623 = vmatprep.subr.bf16.mxu1 %v2685_v39 }
 0x627   :  { %1583 = vmatpush1.bf16.msra.mxu0 %v2688_v40  ;;  %1624 = vmatpush1.bf16.msra.mxu1 %v2691_v41  ;;  %v2798_v41 = vld [vmem:[#allocation35_spill] sm:$0xff] }
 0x628   :  { %1584 = vmatprep.subr.bf16.mxu0 %v2694_v42  ;;  %1625 = vmatprep.subr.bf16.mxu1 %v2002_v14 }
 0x62b   :  { %1585 = vmatpush1.bf16.msra.mxu0 %v2003_v9  ;;  %1626 = vmatpush1.bf16.msra.mxu1 %v2004_v29  ;;  %v2802_v29 = vld [vmem:[#allocation40_spill] sm:$0xff] }
 0x62c   :  { %1586 = vmatprep.subr.bf16.mxu0 %v2005_v35  ;;  %1627 = vmatprep.subr.bf16.mxu1 %v2006_v33 }
 0x62f   :  { %1587 = vmatpush1.bf16.msra.mxu0 %v2007_v34  ;;  %1628 = vmatpush1.bf16.msra.mxu1 %v2008_v13 }
 0x630   :  { %1588 = vmatprep.subr.bf16.mxu0 %v2009_v22  ;;  %1629 = vmatprep.subr.bf16.mxu1 %v2010_v20 }
 0x633   :  { %1589 = vmatpush1.bf16.msra.mxu0 %v2011_v6  ;;  %1630 = vmatpush1.bf16.msra.mxu1 %v2012_v27 }
 0x634   :  { %1590 = vmatprep.subr.bf16.mxu0 %v2013_v31  ;;  %1631 = vmatprep.subr.bf16.mxu1 %v2014_v18 }
 0x637   :  { %1591 = vmatpush1.bf16.msra.mxu0 %v2015_v30  ;;  %1632 = vmatpush1.bf16.msra.mxu1 %v2016_v24 }
 0x6da   :  { %v1488_v62 = vpop.f32.mrf.mxu0  ;;  %v1529_v7 = vpop.f32.mrf.mxu1 }
 0x6db   :  { %v1536_v12 = vadd.f32 %v1488_v62, %v2796_v28  ;;  %v1538_v42 = vadd.f32 %v1529_v7, %v2798_v41 }
 0x6dc   :  { %v1490_v26 = vpop.f32.mrf.mxu0  ;;  %v1531_v11 = vpop.f32.mrf.mxu1 }
 0x6dd   :  { %v1540_v8 = vmul.f32 0.5, %v1536_v12  ;;  %v1537_v38 = vadd.f32 %v1490_v26, %v2797_v23  ;;  %v1539_v57 = vadd.f32 %v1531_v11, %v2799_v56 }
 0x6de   :  { %v1492_v39 = vpop.f32.mrf.mxu0  ;;  %v1533_v40 = vpop.f32.mrf.mxu1 }
 0x6df   :  { %1965 = vtanh.f32 %v1540_v8  ;;  %v1544_v52 = vmul.f32 0.5, %v1537_v38  ;;  %v1549_v58 = vmul.f32 0.5, %v1539_v57 }
 0x6e0   :  { %v1493_v54 = vpop.f32.mrf.mxu0  ;;  %v1534_v55 = vpop.f32.mrf.mxu1 }
 0x6e1   :  { %1967 = vtanh.f32 %v1544_v52 }
 0x6e2   :  { %1969 = vtanh.f32 %v1538_v42 }
 0x6e3   :  { %1971 = vtanh.f32 %v1549_v58 }
 0x6ec   :  { %v1966_v59 = vpop.eup %1965 }
 0x6ed   :  { %v1542_v60 = vadd.f32 1.0, %v1966_v59 }
 0x6ee   :  { %v1968_v61 = vpop.eup %1967 }
 0x6ef   :  { %v1543_v63 = vmul.f32 0.5, %v1542_v60  ;;  %v1546_v1 = vadd.f32 1.0, %v1968_v61  ;;  %v1970_v2 = vpop.eup %1969 }
 0x6f0   :  { %v1972_v36 = vpop.eup %1971 }
 0x6f1   :  { %v1547_v3 = vmul.f32 0.5, %v1546_v1  ;;  %v1554_v4 = vmul.f32 %v1970_v2, %v1543_v63  ;;  %v1551_v37 = vadd.f32 1.0, %v1972_v36 }
 0x6f3   :  { %v1553_v5 = vmul.f32 %v1547_v3, %v2719_v17  ;;  %v1552_v45 = vmul.f32 0.5, %v1551_v37 }
 0x6f5   :  { %v1555_v43 = vadd.f32 %v1554_v4, %v1553_v5 }
 0x6f7   :  { %1973 = vtanh.f32 %v1555_v43 }
 0x704   :  { %v1974_v46 = vpop.eup %1973 }
 0x705   :  { %v1557_v47 = vmul.f32 %v1974_v46, %v1552_v45 }
 0x707   :  { %1561 = vst [vmem:[#allocation14 + $0x30] sm:$0xff] %v1557_v47  ;;  %v1575_v48 = vpack.c.bf16 %v1557_v47, %v1557_v47 }
 0x709   :  { %1609 = vmatmul.mubr.bf16.vlgmr.msra.gmra.mxu0 %v1575_v48  ;;  %1650 = vmatmul.mubr.bf16.vlgmr.msra.gmra.mxu1 %v1575_v48 }
 0x7c9   :  { %v1610_v49 = vpop.f32.mrf.mxu0  ;;  %v1651_v50 = vpop.f32.mrf.mxu1 }
 0x7ca   :  { %v1658_v44 = vadd.f32 %v1610_v49, %v2800_v51  ;;  %v1660_v21 = vadd.f32 %v1651_v50, %v2801_v25 }
 0x7cb   :  { %v1612_v15 = vpop.f32.mrf.mxu0  ;;  %v1653_v16 = vpop.f32.mrf.mxu1 }
 0x7cc   :  { %v1662_v0 = vmul.f32 0.5, %v1658_v44  ;;  %v1659_v17 = vadd.f32 %v1612_v15, %v2462_v32  ;;  %v1661_v35 = vadd.f32 %v1653_v16, %v2802_v29 }
 0x7cd   :  { %v1614_v10 = vpop.f32.mrf.mxu0  ;;  %v1655_v19 = vpop.f32.mrf.mxu1 }
 0x7ce   :  { %1975 = vtanh.f32 %v1662_v0  ;;  %v1666_v53 = vmul.f32 0.5, %v1659_v17  ;;  %v1671_v33 = vmul.f32 0.5, %v1661_v35 }
 0x7cf   :  { %v1615_v14 = vpop.f32.mrf.mxu0  ;;  %v1656_v9 = vpop.f32.mrf.mxu1 }
 0x7d0   :  { %1977 = vtanh.f32 %v1666_v53 }
 0x7d1   :  { %1979 = vtanh.f32 %v1660_v21 }
 0x7d2   :  { %1981 = vtanh.f32 %v1671_v33 }
 0x7db   :  { %v1976_v34 = vpop.eup %1975 }
 0x7dc   :  { %v1664_v13 = vadd.f32 1.0, %v1976_v34 }
 0x7dd   :  { %v1978_v22 = vpop.eup %1977 }
 0x7de   :  { %v1665_v20 = vmul.f32 0.5, %v1664_v13  ;;  %v1668_v6 = vadd.f32 1.0, %v1978_v22  ;;  %v1980_v32 = vpop.eup %1979 }
 0x7e0   :  { %v1669_v27 = vmul.f32 0.5, %v1668_v6  ;;  %v1676_v31 = vmul.f32 %v1980_v32, %v1665_v20 }
 0x7e2   :  { %v1675_v18 = vmul.f32 %v1669_v27, %v1555_v43 }
 0x7e4   :  { %v1677_v30 = vadd.f32 %v1676_v31, %v1675_v18 }
 0x7e6   :  { %1983 = vtanh.f32 %v1677_v30  ;;  %1689 = vst [vmem:[#allocation15] sm:$0xff] %v1677_v30 }
 0x7e7   :  { %2128 = shalt.err (!%p2125_p1)
}
 0x7e8   :  { %1711 = dma.vmem_to_hbm [thread:$0]  %s1709_s27, 128, %s2761_s7, [#allocation16]   ;;  %v1982_v24 = vpop.eup %1981 }
 0x7e9   :  { %v1673_v62 = vadd.f32 1.0, %v1982_v24  ;;  %s2178_s8 = smov [#allocation14]  }
 0x7ea   :  { %s1695_s9 = sshll.u32 %s2178_s8, 4  ;;  %s1696_s9 = int_to_ptr.vmem [resolvable:$true] %s1695_s9 }
 0x7eb   :  { %v1674_v7 = vmul.f32 0.5, %v1673_v62  ;;  %s2137_s10 = scalar_lea.vmem %s1696_s9, 1024  ;;  %p2142_p3 = scmp.lt.s32.totalorder %s1696_s9, %s1696_s9 }
 0x7ec   :  { %p2138_p2 = scmp.ne.s32.totalorder %s1696_s9, %s2137_s10  ;;  %p2143_p4 = scmp.lt.s32.totalorder %s2137_s10, %s2137_s10 }
 0x7ee   :  { %p2144_p5 = por %p2143_p4, %p2142_p3 }
 0x7f0   :  { %p2145_p6 = pnand %p2144_p5, %p2138_p2 }
 0x7f3   :  { %v1984_v28 = vpop.eup %1983 }
 0x7f4   :  { %v1679_v12 = vmul.f32 %v1984_v28, %v1674_v7 }
 0x7f6   :  { %1683 = vst [vmem:[#allocation14 + $0x38] sm:$0xff] %v1679_v12 }
 0x7f7   :  { %2148 = shalt.err (!%p2145_p6)
}
 0x7f8   :  { %s2179_s11 = smov 128   ;;  %s2180_s12 = smov 8  }
 0x7f9   :  { %1701 = dma.vmem_to_hbm [thread:$0]  %s1696_s9, 1024, %s2760_s6, [#allocation7], %s2179_s11, %s2179_s11, %s2180_s12  }
 0x7fa   :  { %2163 = dma.done.wait [#allocation7], 1024  }
 0x7fb   :  { %2164 = vsyncadd [#allocation7], 4294966272 }
 0x7fc   :  { %2165 = dma.done.wait [#allocation16], 128  }
 0x7fd   :  { %2166 = vsyncadd [#allocation16], 4294967168 }
 0x7fe   :  { %1718 = vsyncpa [#allocation6], 1 }
 0x7ff   :  { %1719 = vsyncpa [#allocation9], 1 }
 0x800   :  { %1720 = vsyncpa [#allocation12], 1 }
 0x801   :  { %1721 = vsyncpa [#allocation7], 1 }
 0x802   :  { %1722 = vsyncpa [#allocation16], 1 }

</bundles_post_ra>
